<compile_context>
chip_gen: v7x
topology: tpu7x:2x2x1
jax: 0.10.0
libtpu: 0.0.40
codegen_flags: <defaults>
</compile_context>

<pallas_src>
import math

import jax
import jax.numpy as jnp
from jax.experimental import pallas as pl
from jax.experimental.pallas import tpu as pltpu

INPUT_DIM = 64
NUM_CLASSES = 2
T_EMBED_DIM = 128
NUM_LAYERS = 4
MAX_PERIOD = 10000.0


def _silu(v):
    return v * jax.nn.sigmoid(v)


def _round_up(n, m):
    return ((n + m - 1) // m) * m


def model_kernel(
    t_ref,          # [TB, 1]  f32   timesteps
    lab_ref,        # [TB, 1]  i32   class labels
    x_ref,          # [TB, D]  f32   input (features zero-padded 64 -> 128 lanes)
    freqs_ref,      # [1, D]   f32   freqs[j % half] (precomputed in wrapper)
    label_tab_ref,  # [2, D]   f32   label embedding table
    tw1_ref, tb1_ref, tw2_ref, tb2_ref,   # time_embed MLP   (w bf16, b f32)
    cw1_ref, cb1_ref,                     # fused cond stage-1: [D,(L+1)*2D] bf16, [1,(L+1)*2D] f32
    cw2_ref, cb2_ref,                     # cond stage-2: [L+1, 2D, 2D] bf16, [L+1, 1, 2D] f32
    mw_ref, mb_ref,                       # shared MLP:  [L, D, D] bf16, [L, 1, D] f32
    iw_ref, ib_ref,                       # input proj   (iw zero-padded to [D, D], bf16)
    ow_ref, ob_ref,                       # output proj  (ow/ob zero-padded to 128 lanes)
    o_ref,          # [TB, D]  f32   lane-dense output; first INPUT_DIM lanes valid
):
    D = T_EMBED_DIM
    half = D // 2
    L = NUM_LAYERS
    f32 = jnp.float32
    bf16 = jnp.bfloat16

    # ---- timestep_embedding(t, D), built lane-dense (no 64-lane concat) ----
    args = t_ref[...] * freqs_ref[...]                           # [TB, D]
    lane = jax.lax.broadcasted_iota(jnp.int32, args.shape, 1)
    t_emb = jnp.where(lane < half, jnp.cos(args), jnp.sin(args))  # cos | sin halves

    # ---- time_embed: Linear -> SiLU -> Linear (bf16 MXU operands, f32 accum) ----
    h_t = jnp.dot(t_emb.astype(bf16), tw1_ref[...],
                  preferred_element_type=f32) + tb1_ref[...]
    h_t = _silu(h_t)
    t_embed = jnp.dot(h_t.astype(bf16), tw2_ref[...],
                      preferred_element_type=f32) + tb2_ref[...]

    # ---- label embedding: 2-class VPU select (replaces K=2 one-hot matmul) ----
    tab = label_tab_ref[...]                                     # [2, D]
    label_embed = jnp.where(lab_ref[...] == 0, tab[0:1, :], tab[1:2, :])

    condition = t_embed + label_embed                            # [TB, D] f32

    # ---- all (L+1) condition-block first stages fused into one wide matmul ----
    m1 = jnp.dot(condition.astype(bf16), cw1_ref[...],
                 preferred_element_type=f32) + cb1_ref[...]      # [TB, (L+1)*2D]
    m1 = _silu(m1).astype(bf16)

    # ---- input projection (x lane-padded; padded iw rows are zero) ----
    h = jnp.dot(x_ref[...].astype(bf16), iw_ref[...],
                preferred_element_type=f32) + ib_ref[...]        # [TB, D]

    # ---- shared MLP with FiLM conditioning ----
    for i in range(L + 1):
        mod = jnp.dot(m1[:, i * 2 * D:(i + 1) * 2 * D], cw2_ref[i],
                      preferred_element_type=f32) + cb2_ref[i]   # [TB, 2D]
        scale = mod[:, :D]
        shift = mod[:, D:]
        h = h * (1.0 + scale) + shift
        if i < L:
            h = jnp.dot(h.astype(bf16), mw_ref[i],
                        preferred_element_type=f32) + mb_ref[i]
            h = _silu(h)

    # ---- output projection (padded to 128 lanes -> unmasked full-vreg stores) ----
    o_ref[...] = jnp.dot(h.astype(bf16), ow_ref[...],
                         preferred_element_type=f32) + ob_ref[...]


def init_params(key):
    """Deterministic synthetic parameters (shapes match the PyTorch __init__)."""
    D, I, C, L = T_EMBED_DIM, INPUT_DIM, NUM_CLASSES, NUM_LAYERS
    ks = jax.random.split(key, 16)
    s = 0.05

    def w(k, shape):
        return jax.random.normal(k, shape, jnp.float32) * s

    params = dict(
        label_tab=w(ks[0], (C, D)),
        tw1=w(ks[1], (D, D)), tb1=w(ks[2], (1, D)),
        tw2=w(ks[3], (D, D)), tb2=w(ks[4], (1, D)),
        cw1=w(ks[5], (L + 1, D, 2 * D)), cb1=w(ks[6], (L + 1, 1, 2 * D)),
        cw2=w(ks[7], (L + 1, 2 * D, 2 * D)), cb2=w(ks[8], (L + 1, 1, 2 * D)),
        mw=w(ks[9], (L, D, D)), mb=w(ks[10], (L, 1, D)),
        iw=w(ks[11], (I, D)), ib=w(ks[12], (1, D)),
        ow=w(ks[13], (D, I)), ob=w(ks[14], (1, I)),
    )
    return params


def conditional_diffusion_forward(params, x, labels, t):
    D, I, L, C = T_EMBED_DIM, INPUT_DIM, NUM_LAYERS, NUM_CLASSES
    assert C == 2, "VPU-select label embedding assumes 2 classes"
    B = x.shape[0]
    half = D // 2

    # Batch tile: multiple of 8 sublanes, cap at 256 rows (fills v6e/v7x MXU rows,
    # multiple of 128 for v5e). Batch is zero-padded to a multiple of TB.
    TB = 256 if B >= 256 else _round_up(max(B, 1), 8)
    B_pad = _round_up(B, TB)
    n_tiles = B_pad // TB

    # ---- batched inputs, zero-padded (padded rows produce junk, sliced off) ----
    t_p = jnp.zeros((B_pad, 1), jnp.float32).at[:B, 0].set(t.astype(jnp.float32))
    lab_p = jnp.zeros((B_pad, 1), jnp.int32).at[:B, 0].set(labels.astype(jnp.int32))
    x_p = jnp.zeros((B_pad, D), jnp.float32).at[:B, :I].set(x.astype(jnp.float32))

    # ---- one-time weight prep: hoisted freqs, fused cond stage-1, lane padding,
    #      bf16 matmul operands (biases stay f32) ----
    freqs = jnp.exp(-math.log(MAX_PERIOD)
                    * jnp.arange(half, dtype=jnp.float32) / half)
    freqs_full = jnp.concatenate([freqs, freqs]).reshape(1, D)

    bf = lambda a: a.astype(jnp.bfloat16)
    cw1_all = bf(jnp.transpose(params["cw1"], (1, 0, 2)).reshape(D, (L + 1) * 2 * D))
    cb1_all = jnp.transpose(params["cb1"], (1, 0, 2)).reshape(1, (L + 1) * 2 * D)

    iw_pad = jnp.zeros((D, D), jnp.float32).at[:I, :].set(params["iw"])
    ow_pad = jnp.zeros((D, D), jnp.float32).at[:, :I].set(params["ow"])
    ob_pad = jnp.zeros((1, D), jnp.float32).at[:, :I].set(params["ob"])

    batched_inputs = (t_p, lab_p, x_p)
    weight_inputs = (
        freqs_full, params["label_tab"],
        bf(params["tw1"]), params["tb1"], bf(params["tw2"]), params["tb2"],
        cw1_all, cb1_all,
        bf(params["cw2"]), params["cb2"],
        bf(params["mw"]), params["mb"],
        bf(iw_pad), params["ib"],
        bf(ow_pad), ob_pad,
    )

    batched_specs = [
        pl.BlockSpec((TB, a.shape[1]), lambda b: (b, 0)) for a in batched_inputs
    ]
    # Full-shape blocks with constant index_map -> weights stay VMEM-resident
    # across grid steps (no re-DMA).
    weight_specs = [
        pl.BlockSpec(a.shape, lambda b, n=a.ndim: (0,) * n) for a in weight_inputs
    ]

    # Advisory cost hints for XLA scheduling.
    flops = 2 * B_pad * (4 * D * D                 # tw1, tw2, iw, ow
                         + D * (L + 1) * 2 * D     # fused cond stage-1
                         + (L + 1) * 4 * D * D     # cond stage-2
                         + L * D * D)              # shared MLP
    transcendentals = B_pad * (2 * D + (L + 1) * 2 * D + L * D)
    bytes_accessed = (sum(int(a.size) * a.dtype.itemsize
                          for a in batched_inputs + weight_inputs)
                      + B_pad * D * 4)

    out_pad = pl.pallas_call(
        model_kernel,
        grid=(n_tiles,),
        out_shape=jax.ShapeDtypeStruct((B_pad, D), jnp.float32),
        in_specs=batched_specs + weight_specs,
        out_specs=pl.BlockSpec((TB, D), lambda b: (b, 0)),
        compiler_params=pltpu.CompilerParams(
            dimension_semantics=("parallel",)),
        cost_estimate=pl.CostEstimate(
            flops=flops, transcendentals=transcendentals,
            bytes_accessed=bytes_accessed),
    )(*batched_inputs, *weight_inputs)

    return out_pad[:B, :I]


# ------------------------- pure-JAX reference (f32) --------------------------
def reference_forward(params, x, labels, t):
    D = T_EMBED_DIM
    half = D // 2
    freqs = jnp.exp(-math.log(MAX_PERIOD)
                    * jnp.arange(half, dtype=jnp.float32) / half)
    args = t.astype(jnp.float32)[:, None] * freqs[None]
    t_emb = jnp.concatenate([jnp.cos(args), jnp.sin(args)], axis=-1)

    h_t = _silu(t_emb @ params["tw1"] + params["tb1"])
    t_embed = h_t @ params["tw2"] + params["tb2"]
    label_embed = jnp.take(params["label_tab"], labels, axis=0)
    condition = t_embed + label_embed

    h = x @ params["iw"] + params["ib"]

    def cond_block(i):
        m = _silu(condition @ params["cw1"][i] + params["cb1"][i])
        return m @ params["cw2"][i] + params["cb2"][i]

    for i in range(NUM_LAYERS):
        mod = cond_block(i)
        scale, shift = mod[:, :D], mod[:, D:]
        h = h * (1.0 + scale) + shift
        h = _silu(h @ params["mw"][i] + params["mb"][i])

    mod = cond_block(NUM_LAYERS)
    scale, shift = mod[:, :D], mod[:, D:]
    h = h * (1.0 + scale) + shift
    return h @ params["ow"] + params["ob"]


if __name__ == "__main__":
    key = jax.random.PRNGKey(0)
    k_param, k_x, k_lab, k_t = jax.random.split(key, 4)

    B = 8
    params = init_params(k_param)
    x = jax.random.normal(k_x, (B, INPUT_DIM), jnp.float32)
    labels = jax.random.randint(k_lab, (B,), 0, NUM_CLASSES, jnp.int32)
    t = jax.random.randint(k_t, (B,), 0, 1000, jnp.int32)

    out = conditional_diffusion_forward(params, x, labels, t)
    out = jax.block_until_ready(out)

    ref = reference_forward(params, x, labels, t)
    assert out.shape == (B, INPUT_DIM)
    assert bool(jnp.all(jnp.isfinite(out)))
    max_diff = float(jnp.max(jnp.abs(out - ref)))
    # bf16 matmul operands (f32 accumulation) vs pure-f32 reference.
    assert max_diff < 5e-2, f"mismatch vs reference: {max_diff}"

    print("KERNEL_OK")
</pallas_src>

<mosaic_0001>
module attributes {stable_mosaic.version = 11 : i64} {
  func.func @model_kernel(%arg0: i32, %arg1: memref<8x1xf32, #tpu.memory_space<vmem>>, %arg2: memref<8x1xi32, #tpu.memory_space<vmem>>, %arg3: memref<8x128xf32, #tpu.memory_space<vmem>>, %arg4: memref<1x128xf32, #tpu.memory_space<vmem>>, %arg5: memref<2x128xf32, #tpu.memory_space<vmem>>, %arg6: memref<128x128xbf16, #tpu.memory_space<vmem>>, %arg7: memref<1x128xf32, #tpu.memory_space<vmem>>, %arg8: memref<128x128xbf16, #tpu.memory_space<vmem>>, %arg9: memref<1x128xf32, #tpu.memory_space<vmem>>, %arg10: memref<128x1280xbf16, #tpu.memory_space<vmem>>, %arg11: memref<1x1280xf32, #tpu.memory_space<vmem>>, %arg12: memref<5x256x256xbf16, #tpu.memory_space<vmem>>, %arg13: memref<5x1x256xf32, #tpu.memory_space<vmem>>, %arg14: memref<4x128x128xbf16, #tpu.memory_space<vmem>>, %arg15: memref<4x1x128xf32, #tpu.memory_space<vmem>>, %arg16: memref<128x128xbf16, #tpu.memory_space<vmem>>, %arg17: memref<1x128xf32, #tpu.memory_space<vmem>>, %arg18: memref<128x128xbf16, #tpu.memory_space<vmem>>, %arg19: memref<1x128xf32, #tpu.memory_space<vmem>>, %arg20: memref<8x128xf32, #tpu.memory_space<vmem>>) attributes {dimension_semantics = [#tpu.dimension_semantics<parallel>], iteration_bounds = array<i64: 1>, scalar_prefetch = 0 : i64, scratch_operands = 0 : i64, tpu.core_type = #tpu.core_type<tc>, window_params = [{transform_indices = @transform_0, window_bounds = array<i64: 8, 1>}, {transform_indices = @transform_1, window_bounds = array<i64: 8, 1>}, {transform_indices = @transform_2, window_bounds = array<i64: 8, 128>}, {pipeline_mode = #tpu.pipeline_mode<synchronous>, transform_indices = @transform_3, window_bounds = array<i64: 1, 128>}, {pipeline_mode = #tpu.pipeline_mode<synchronous>, transform_indices = @transform_4, window_bounds = array<i64: 2, 128>}, {pipeline_mode = #tpu.pipeline_mode<synchronous>, transform_indices = @transform_5, window_bounds = array<i64: 128, 128>}, {pipeline_mode = #tpu.pipeline_mode<synchronous>, transform_indices = @transform_6, window_bounds = array<i64: 1, 128>}, {pipeline_mode = #tpu.pipeline_mode<synchronous>, transform_indices = @transform_7, window_bounds = array<i64: 128, 128>}, {pipeline_mode = #tpu.pipeline_mode<synchronous>, transform_indices = @transform_8, window_bounds = array<i64: 1, 128>}, {pipeline_mode = #tpu.pipeline_mode<synchronous>, transform_indices = @transform_9, window_bounds = array<i64: 128, 1280>}, {pipeline_mode = #tpu.pipeline_mode<synchronous>, transform_indices = @transform_10, window_bounds = array<i64: 1, 1280>}, {pipeline_mode = #tpu.pipeline_mode<synchronous>, transform_indices = @transform_11, window_bounds = array<i64: 5, 256, 256>}, {pipeline_mode = #tpu.pipeline_mode<synchronous>, transform_indices = @transform_12, window_bounds = array<i64: 5, 1, 256>}, {pipeline_mode = #tpu.pipeline_mode<synchronous>, transform_indices = @transform_13, window_bounds = array<i64: 4, 128, 128>}, {pipeline_mode = #tpu.pipeline_mode<synchronous>, transform_indices = @transform_14, window_bounds = array<i64: 4, 1, 128>}, {pipeline_mode = #tpu.pipeline_mode<synchronous>, transform_indices = @transform_15, window_bounds = array<i64: 128, 128>}, {pipeline_mode = #tpu.pipeline_mode<synchronous>, transform_indices = @transform_16, window_bounds = array<i64: 1, 128>}, {pipeline_mode = #tpu.pipeline_mode<synchronous>, transform_indices = @transform_17, window_bounds = array<i64: 128, 128>}, {pipeline_mode = #tpu.pipeline_mode<synchronous>, transform_indices = @transform_18, window_bounds = array<i64: 1, 128>}, {transform_indices = @transform_19, window_bounds = array<i64: 8, 128>}]} {
    %c0 = arith.constant 0 : index
    %c0_0 = arith.constant 0 : index
    %0 = vector.load %arg1[%c0, %c0_0] : memref<8x1xf32, #tpu.memory_space<vmem>>, vector<8x1xf32>
    %c0_1 = arith.constant 0 : index
    %c0_2 = arith.constant 0 : index
    %1 = vector.load %arg4[%c0_1, %c0_2] : memref<1x128xf32, #tpu.memory_space<vmem>>, vector<1x128xf32>
    %2 = vector.broadcast %0 : vector<8x1xf32> to vector<8x128xf32>
    %3 = vector.broadcast %1 : vector<1x128xf32> to vector<8x128xf32>
    %4 = arith.mulf %2, %3 : vector<8x128xf32>
    %5 = tpu.iota {dimensions = array<i32: 1>} : vector<8x128xi32>
    %c64_i32 = arith.constant 64 : i32
    %6 = vector.broadcast %c64_i32 : i32 to vector<8x128xi32>
    %7 = arith.cmpi slt, %5, %6 : vector<8x128xi32>
    %8 = math.cos %4 : vector<8x128xf32>
    %9 = math.sin %4 : vector<8x128xf32>
    %10 = arith.select %7, %8, %9 : vector<8x128xi1>, vector<8x128xf32>
    %11 = arith.truncf %10 : vector<8x128xf32> to vector<8x128xbf16>
    %c0_3 = arith.constant 0 : index
    %c0_4 = arith.constant 0 : index
    %12 = vector.load %arg6[%c0_3, %c0_4] : memref<128x128xbf16, #tpu.memory_space<vmem>>, vector<128x128xbf16>
    %cst = arith.constant dense<0.000000e+00> : vector<8x128xf32>
    %13 = tpu.matmul %11, %12, %cst {dimension_numbers = #tpu.dot_dimension_numbers<[1], [0], [0], [1], [0, 0, 1, 1], [], []>} : vector<8x128xbf16>, vector<128x128xbf16>, vector<8x128xf32> -> vector<8x128xf32>
    %c0_5 = arith.constant 0 : index
    %c0_6 = arith.constant 0 : index
    %14 = vector.load %arg7[%c0_5, %c0_6] : memref<1x128xf32, #tpu.memory_space<vmem>>, vector<1x128xf32>
    %15 = vector.broadcast %14 : vector<1x128xf32> to vector<8x128xf32>
    %16 = arith.addf %13, %15 : vector<8x128xf32>
    %17 = arith.negf %16 : vector<8x128xf32>
    %18 = math.exp %17 : vector<8x128xf32>
    %cst_7 = arith.constant 1.000000e+00 : f32
    %19 = vector.broadcast %cst_7 : f32 to vector<8x128xf32>
    %20 = arith.addf %19, %18 : vector<8x128xf32>
    %21 = arith.divf %19, %20 : vector<8x128xf32>
    %22 = arith.mulf %16, %21 : vector<8x128xf32>
    %23 = arith.truncf %22 : vector<8x128xf32> to vector<8x128xbf16>
    %c0_8 = arith.constant 0 : index
    %c0_9 = arith.constant 0 : index
    %24 = vector.load %arg8[%c0_8, %c0_9] : memref<128x128xbf16, #tpu.memory_space<vmem>>, vector<128x128xbf16>
    %cst_10 = arith.constant dense<0.000000e+00> : vector<8x128xf32>
    %25 = tpu.matmul %23, %24, %cst_10 {dimension_numbers = #tpu.dot_dimension_numbers<[1], [0], [0], [1], [0, 0, 1, 1], [], []>} : vector<8x128xbf16>, vector<128x128xbf16>, vector<8x128xf32> -> vector<8x128xf32>
    %c0_11 = arith.constant 0 : index
    %c0_12 = arith.constant 0 : index
    %26 = vector.load %arg9[%c0_11, %c0_12] : memref<1x128xf32, #tpu.memory_space<vmem>>, vector<1x128xf32>
    %27 = vector.broadcast %26 : vector<1x128xf32> to vector<8x128xf32>
    %28 = arith.addf %25, %27 : vector<8x128xf32>
    %c0_13 = arith.constant 0 : index
    %c0_14 = arith.constant 0 : index
    %29 = vector.load %arg5[%c0_13, %c0_14] : memref<2x128xf32, #tpu.memory_space<vmem>>, vector<2x128xf32>
    %c0_15 = arith.constant 0 : index
    %c0_16 = arith.constant 0 : index
    %30 = vector.load %arg2[%c0_15, %c0_16] : memref<8x1xi32, #tpu.memory_space<vmem>>, vector<8x1xi32>
    %c0_i32 = arith.constant 0 : i32
    %31 = vector.broadcast %c0_i32 : i32 to vector<8x1xi32>
    %32 = arith.cmpi eq, %30, %31 : vector<8x1xi32>
    %33 = vector.extract_strided_slice %29 {offsets = [0, 0], sizes = [1, 128], strides = [1, 1]} : vector<2x128xf32> to vector<1x128xf32>
    %34 = vector.extract_strided_slice %29 {offsets = [1, 0], sizes = [1, 128], strides = [1, 1]} : vector<2x128xf32> to vector<1x128xf32>
    %35 = vector.shape_cast %32 : vector<8x1xi1> to vector<8x1xi1>
    %36 = vector.broadcast %35 : vector<8x1xi1> to vector<8x128xi1>
    %37 = vector.shape_cast %33 : vector<1x128xf32> to vector<1x128xf32>
    %38 = vector.broadcast %37 : vector<1x128xf32> to vector<8x128xf32>
    %39 = vector.shape_cast %34 : vector<1x128xf32> to vector<1x128xf32>
    %40 = vector.broadcast %39 : vector<1x128xf32> to vector<8x128xf32>
    %41 = arith.select %36, %38, %40 : vector<8x128xi1>, vector<8x128xf32>
    %42 = arith.addf %28, %41 : vector<8x128xf32>
    %43 = arith.truncf %42 : vector<8x128xf32> to vector<8x128xbf16>
    %c0_17 = arith.constant 0 : index
    %c0_18 = arith.constant 0 : index
    %44 = vector.load %arg10[%c0_17, %c0_18] : memref<128x1280xbf16, #tpu.memory_space<vmem>>, vector<128x1280xbf16>
    %cst_19 = arith.constant dense<0.000000e+00> : vector<8x1280xf32>
    %45 = tpu.matmul %43, %44, %cst_19 {dimension_numbers = #tpu.dot_dimension_numbers<[1], [0], [0], [1], [0, 0, 1, 1], [], []>} : vector<8x128xbf16>, vector<128x1280xbf16>, vector<8x1280xf32> -> vector<8x1280xf32>
    %c0_20 = arith.constant 0 : index
    %c0_21 = arith.constant 0 : index
    %46 = vector.load %arg11[%c0_20, %c0_21] : memref<1x1280xf32, #tpu.memory_space<vmem>>, vector<1x1280xf32>
    %47 = vector.broadcast %46 : vector<1x1280xf32> to vector<8x1280xf32>
    %48 = arith.addf %45, %47 : vector<8x1280xf32>
    %49 = arith.negf %48 : vector<8x1280xf32>
    %50 = math.exp %49 : vector<8x1280xf32>
    %cst_22 = arith.constant 1.000000e+00 : f32
    %51 = vector.broadcast %cst_22 : f32 to vector<8x1280xf32>
    %52 = arith.addf %51, %50 : vector<8x1280xf32>
    %53 = arith.divf %51, %52 : vector<8x1280xf32>
    %54 = arith.mulf %48, %53 : vector<8x1280xf32>
    %55 = arith.truncf %54 : vector<8x1280xf32> to vector<8x1280xbf16>
    %c0_23 = arith.constant 0 : index
    %c0_24 = arith.constant 0 : index
    %56 = vector.load %arg3[%c0_23, %c0_24] : memref<8x128xf32, #tpu.memory_space<vmem>>, vector<8x128xf32>
    %57 = arith.truncf %56 : vector<8x128xf32> to vector<8x128xbf16>
    %c0_25 = arith.constant 0 : index
    %c0_26 = arith.constant 0 : index
    %58 = vector.load %arg16[%c0_25, %c0_26] : memref<128x128xbf16, #tpu.memory_space<vmem>>, vector<128x128xbf16>
    %cst_27 = arith.constant dense<0.000000e+00> : vector<8x128xf32>
    %59 = tpu.matmul %57, %58, %cst_27 {dimension_numbers = #tpu.dot_dimension_numbers<[1], [0], [0], [1], [0, 0, 1, 1], [], []>} : vector<8x128xbf16>, vector<128x128xbf16>, vector<8x128xf32> -> vector<8x128xf32>
    %c0_28 = arith.constant 0 : index
    %c0_29 = arith.constant 0 : index
    %60 = vector.load %arg17[%c0_28, %c0_29] : memref<1x128xf32, #tpu.memory_space<vmem>>, vector<1x128xf32>
    %61 = vector.broadcast %60 : vector<1x128xf32> to vector<8x128xf32>
    %62 = arith.addf %59, %61 : vector<8x128xf32>
    %63 = vector.extract_strided_slice %55 {offsets = [0, 0], sizes = [8, 256], strides = [1, 1]} : vector<8x1280xbf16> to vector<8x256xbf16>
    %c0_30 = arith.constant 0 : index
    %c0_31 = arith.constant 0 : index
    %c0_32 = arith.constant 0 : index
    %64 = vector.load %arg12[%c0_30, %c0_31, %c0_32] : memref<5x256x256xbf16, #tpu.memory_space<vmem>>, vector<1x256x256xbf16>
    %65 = vector.shape_cast %64 : vector<1x256x256xbf16> to vector<256x256xbf16>
    %cst_33 = arith.constant dense<0.000000e+00> : vector<8x256xf32>
    %66 = tpu.matmul %63, %65, %cst_33 {dimension_numbers = #tpu.dot_dimension_numbers<[1], [0], [0], [1], [0, 0, 1, 1], [], []>} : vector<8x256xbf16>, vector<256x256xbf16>, vector<8x256xf32> -> vector<8x256xf32>
    %c0_34 = arith.constant 0 : index
    %c0_35 = arith.constant 0 : index
    %c0_36 = arith.constant 0 : index
    %67 = vector.load %arg13[%c0_34, %c0_35, %c0_36] : memref<5x1x256xf32, #tpu.memory_space<vmem>>, vector<1x1x256xf32>
    %68 = vector.shape_cast %67 : vector<1x1x256xf32> to vector<1x256xf32>
    %69 = vector.broadcast %68 : vector<1x256xf32> to vector<8x256xf32>
    %70 = arith.addf %66, %69 : vector<8x256xf32>
    %71 = vector.extract_strided_slice %70 {offsets = [0, 0], sizes = [8, 128], strides = [1, 1]} : vector<8x256xf32> to vector<8x128xf32>
    %72 = vector.extract_strided_slice %70 {offsets = [0, 128], sizes = [8, 128], strides = [1, 1]} : vector<8x256xf32> to vector<8x128xf32>
    %cst_37 = arith.constant 1.000000e+00 : f32
    %73 = vector.broadcast %cst_37 : f32 to vector<8x128xf32>
    %74 = arith.addf %73, %71 : vector<8x128xf32>
    %75 = arith.mulf %62, %74 : vector<8x128xf32>
    %76 = arith.addf %75, %72 : vector<8x128xf32>
    %77 = arith.truncf %76 : vector<8x128xf32> to vector<8x128xbf16>
    %c0_38 = arith.constant 0 : index
    %c0_39 = arith.constant 0 : index
    %c0_40 = arith.constant 0 : index
    %78 = vector.load %arg14[%c0_38, %c0_39, %c0_40] : memref<4x128x128xbf16, #tpu.memory_space<vmem>>, vector<1x128x128xbf16>
    %79 = vector.shape_cast %78 : vector<1x128x128xbf16> to vector<128x128xbf16>
    %cst_41 = arith.constant dense<0.000000e+00> : vector<8x128xf32>
    %80 = tpu.matmul %77, %79, %cst_41 {dimension_numbers = #tpu.dot_dimension_numbers<[1], [0], [0], [1], [0, 0, 1, 1], [], []>} : vector<8x128xbf16>, vector<128x128xbf16>, vector<8x128xf32> -> vector<8x128xf32>
    %c0_42 = arith.constant 0 : index
    %c0_43 = arith.constant 0 : index
    %c0_44 = arith.constant 0 : index
    %81 = vector.load %arg15[%c0_42, %c0_43, %c0_44] : memref<4x1x128xf32, #tpu.memory_space<vmem>>, vector<1x1x128xf32>
    %82 = vector.shape_cast %81 : vector<1x1x128xf32> to vector<1x128xf32>
    %83 = vector.broadcast %82 : vector<1x128xf32> to vector<8x128xf32>
    %84 = arith.addf %80, %83 : vector<8x128xf32>
    %85 = arith.negf %84 : vector<8x128xf32>
    %86 = math.exp %85 : vector<8x128xf32>
    %cst_45 = arith.constant 1.000000e+00 : f32
    %87 = vector.broadcast %cst_45 : f32 to vector<8x128xf32>
    %88 = arith.addf %87, %86 : vector<8x128xf32>
    %89 = arith.divf %87, %88 : vector<8x128xf32>
    %90 = arith.mulf %84, %89 : vector<8x128xf32>
    %91 = vector.extract_strided_slice %55 {offsets = [0, 256], sizes = [8, 256], strides = [1, 1]} : vector<8x1280xbf16> to vector<8x256xbf16>
    %c1 = arith.constant 1 : index
    %c0_46 = arith.constant 0 : index
    %c0_47 = arith.constant 0 : index
    %92 = vector.load %arg12[%c1, %c0_46, %c0_47] : memref<5x256x256xbf16, #tpu.memory_space<vmem>>, vector<1x256x256xbf16>
    %93 = vector.shape_cast %92 : vector<1x256x256xbf16> to vector<256x256xbf16>
    %cst_48 = arith.constant dense<0.000000e+00> : vector<8x256xf32>
    %94 = tpu.matmul %91, %93, %cst_48 {dimension_numbers = #tpu.dot_dimension_numbers<[1], [0], [0], [1], [0, 0, 1, 1], [], []>} : vector<8x256xbf16>, vector<256x256xbf16>, vector<8x256xf32> -> vector<8x256xf32>
    %c1_49 = arith.constant 1 : index
    %c0_50 = arith.constant 0 : index
    %c0_51 = arith.constant 0 : index
    %95 = vector.load %arg13[%c1_49, %c0_50, %c0_51] : memref<5x1x256xf32, #tpu.memory_space<vmem>>, vector<1x1x256xf32>
    %96 = vector.shape_cast %95 : vector<1x1x256xf32> to vector<1x256xf32>
    %97 = vector.broadcast %96 : vector<1x256xf32> to vector<8x256xf32>
    %98 = arith.addf %94, %97 : vector<8x256xf32>
    %99 = vector.extract_strided_slice %98 {offsets = [0, 0], sizes = [8, 128], strides = [1, 1]} : vector<8x256xf32> to vector<8x128xf32>
    %100 = vector.extract_strided_slice %98 {offsets = [0, 128], sizes = [8, 128], strides = [1, 1]} : vector<8x256xf32> to vector<8x128xf32>
    %cst_52 = arith.constant 1.000000e+00 : f32
    %101 = vector.broadcast %cst_52 : f32 to vector<8x128xf32>
    %102 = arith.addf %101, %99 : vector<8x128xf32>
    %103 = arith.mulf %90, %102 : vector<8x128xf32>
    %104 = arith.addf %103, %100 : vector<8x128xf32>
    %105 = arith.truncf %104 : vector<8x128xf32> to vector<8x128xbf16>
    %c1_53 = arith.constant 1 : index
    %c0_54 = arith.constant 0 : index
    %c0_55 = arith.constant 0 : index
    %106 = vector.load %arg14[%c1_53, %c0_54, %c0_55] : memref<4x128x128xbf16, #tpu.memory_space<vmem>>, vector<1x128x128xbf16>
    %107 = vector.shape_cast %106 : vector<1x128x128xbf16> to vector<128x128xbf16>
    %cst_56 = arith.constant dense<0.000000e+00> : vector<8x128xf32>
    %108 = tpu.matmul %105, %107, %cst_56 {dimension_numbers = #tpu.dot_dimension_numbers<[1], [0], [0], [1], [0, 0, 1, 1], [], []>} : vector<8x128xbf16>, vector<128x128xbf16>, vector<8x128xf32> -> vector<8x128xf32>
    %c1_57 = arith.constant 1 : index
    %c0_58 = arith.constant 0 : index
    %c0_59 = arith.constant 0 : index
    %109 = vector.load %arg15[%c1_57, %c0_58, %c0_59] : memref<4x1x128xf32, #tpu.memory_space<vmem>>, vector<1x1x128xf32>
    %110 = vector.shape_cast %109 : vector<1x1x128xf32> to vector<1x128xf32>
    %111 = vector.broadcast %110 : vector<1x128xf32> to vector<8x128xf32>
    %112 = arith.addf %108, %111 : vector<8x128xf32>
    %113 = arith.negf %112 : vector<8x128xf32>
    %114 = math.exp %113 : vector<8x128xf32>
    %cst_60 = arith.constant 1.000000e+00 : f32
    %115 = vector.broadcast %cst_60 : f32 to vector<8x128xf32>
    %116 = arith.addf %115, %114 : vector<8x128xf32>
    %117 = arith.divf %115, %116 : vector<8x128xf32>
    %118 = arith.mulf %112, %117 : vector<8x128xf32>
    %119 = vector.extract_strided_slice %55 {offsets = [0, 512], sizes = [8, 256], strides = [1, 1]} : vector<8x1280xbf16> to vector<8x256xbf16>
    %c2 = arith.constant 2 : index
    %c0_61 = arith.constant 0 : index
    %c0_62 = arith.constant 0 : index
    %120 = vector.load %arg12[%c2, %c0_61, %c0_62] : memref<5x256x256xbf16, #tpu.memory_space<vmem>>, vector<1x256x256xbf16>
    %121 = vector.shape_cast %120 : vector<1x256x256xbf16> to vector<256x256xbf16>
    %cst_63 = arith.constant dense<0.000000e+00> : vector<8x256xf32>
    %122 = tpu.matmul %119, %121, %cst_63 {dimension_numbers = #tpu.dot_dimension_numbers<[1], [0], [0], [1], [0, 0, 1, 1], [], []>} : vector<8x256xbf16>, vector<256x256xbf16>, vector<8x256xf32> -> vector<8x256xf32>
    %c2_64 = arith.constant 2 : index
    %c0_65 = arith.constant 0 : index
    %c0_66 = arith.constant 0 : index
    %123 = vector.load %arg13[%c2_64, %c0_65, %c0_66] : memref<5x1x256xf32, #tpu.memory_space<vmem>>, vector<1x1x256xf32>
    %124 = vector.shape_cast %123 : vector<1x1x256xf32> to vector<1x256xf32>
    %125 = vector.broadcast %124 : vector<1x256xf32> to vector<8x256xf32>
    %126 = arith.addf %122, %125 : vector<8x256xf32>
    %127 = vector.extract_strided_slice %126 {offsets = [0, 0], sizes = [8, 128], strides = [1, 1]} : vector<8x256xf32> to vector<8x128xf32>
    %128 = vector.extract_strided_slice %126 {offsets = [0, 128], sizes = [8, 128], strides = [1, 1]} : vector<8x256xf32> to vector<8x128xf32>
    %cst_67 = arith.constant 1.000000e+00 : f32
    %129 = vector.broadcast %cst_67 : f32 to vector<8x128xf32>
    %130 = arith.addf %129, %127 : vector<8x128xf32>
    %131 = arith.mulf %118, %130 : vector<8x128xf32>
    %132 = arith.addf %131, %128 : vector<8x128xf32>
    %133 = arith.truncf %132 : vector<8x128xf32> to vector<8x128xbf16>
    %c2_68 = arith.constant 2 : index
    %c0_69 = arith.constant 0 : index
    %c0_70 = arith.constant 0 : index
    %134 = vector.load %arg14[%c2_68, %c0_69, %c0_70] : memref<4x128x128xbf16, #tpu.memory_space<vmem>>, vector<1x128x128xbf16>
    %135 = vector.shape_cast %134 : vector<1x128x128xbf16> to vector<128x128xbf16>
    %cst_71 = arith.constant dense<0.000000e+00> : vector<8x128xf32>
    %136 = tpu.matmul %133, %135, %cst_71 {dimension_numbers = #tpu.dot_dimension_numbers<[1], [0], [0], [1], [0, 0, 1, 1], [], []>} : vector<8x128xbf16>, vector<128x128xbf16>, vector<8x128xf32> -> vector<8x128xf32>
    %c2_72 = arith.constant 2 : index
    %c0_73 = arith.constant 0 : index
    %c0_74 = arith.constant 0 : index
    %137 = vector.load %arg15[%c2_72, %c0_73, %c0_74] : memref<4x1x128xf32, #tpu.memory_space<vmem>>, vector<1x1x128xf32>
    %138 = vector.shape_cast %137 : vector<1x1x128xf32> to vector<1x128xf32>
    %139 = vector.broadcast %138 : vector<1x128xf32> to vector<8x128xf32>
    %140 = arith.addf %136, %139 : vector<8x128xf32>
    %141 = arith.negf %140 : vector<8x128xf32>
    %142 = math.exp %141 : vector<8x128xf32>
    %cst_75 = arith.constant 1.000000e+00 : f32
    %143 = vector.broadcast %cst_75 : f32 to vector<8x128xf32>
    %144 = arith.addf %143, %142 : vector<8x128xf32>
    %145 = arith.divf %143, %144 : vector<8x128xf32>
    %146 = arith.mulf %140, %145 : vector<8x128xf32>
    %147 = vector.extract_strided_slice %55 {offsets = [0, 768], sizes = [8, 256], strides = [1, 1]} : vector<8x1280xbf16> to vector<8x256xbf16>
    %c3 = arith.constant 3 : index
    %c0_76 = arith.constant 0 : index
    %c0_77 = arith.constant 0 : index
    %148 = vector.load %arg12[%c3, %c0_76, %c0_77] : memref<5x256x256xbf16, #tpu.memory_space<vmem>>, vector<1x256x256xbf16>
    %149 = vector.shape_cast %148 : vector<1x256x256xbf16> to vector<256x256xbf16>
    %cst_78 = arith.constant dense<0.000000e+00> : vector<8x256xf32>
    %150 = tpu.matmul %147, %149, %cst_78 {dimension_numbers = #tpu.dot_dimension_numbers<[1], [0], [0], [1], [0, 0, 1, 1], [], []>} : vector<8x256xbf16>, vector<256x256xbf16>, vector<8x256xf32> -> vector<8x256xf32>
    %c3_79 = arith.constant 3 : index
    %c0_80 = arith.constant 0 : index
    %c0_81 = arith.constant 0 : index
    %151 = vector.load %arg13[%c3_79, %c0_80, %c0_81] : memref<5x1x256xf32, #tpu.memory_space<vmem>>, vector<1x1x256xf32>
    %152 = vector.shape_cast %151 : vector<1x1x256xf32> to vector<1x256xf32>
    %153 = vector.broadcast %152 : vector<1x256xf32> to vector<8x256xf32>
    %154 = arith.addf %150, %153 : vector<8x256xf32>
    %155 = vector.extract_strided_slice %154 {offsets = [0, 0], sizes = [8, 128], strides = [1, 1]} : vector<8x256xf32> to vector<8x128xf32>
    %156 = vector.extract_strided_slice %154 {offsets = [0, 128], sizes = [8, 128], strides = [1, 1]} : vector<8x256xf32> to vector<8x128xf32>
    %cst_82 = arith.constant 1.000000e+00 : f32
    %157 = vector.broadcast %cst_82 : f32 to vector<8x128xf32>
    %158 = arith.addf %157, %155 : vector<8x128xf32>
    %159 = arith.mulf %146, %158 : vector<8x128xf32>
    %160 = arith.addf %159, %156 : vector<8x128xf32>
    %161 = arith.truncf %160 : vector<8x128xf32> to vector<8x128xbf16>
    %c3_83 = arith.constant 3 : index
    %c0_84 = arith.constant 0 : index
    %c0_85 = arith.constant 0 : index
    %162 = vector.load %arg14[%c3_83, %c0_84, %c0_85] : memref<4x128x128xbf16, #tpu.memory_space<vmem>>, vector<1x128x128xbf16>
    %163 = vector.shape_cast %162 : vector<1x128x128xbf16> to vector<128x128xbf16>
    %cst_86 = arith.constant dense<0.000000e+00> : vector<8x128xf32>
    %164 = tpu.matmul %161, %163, %cst_86 {dimension_numbers = #tpu.dot_dimension_numbers<[1], [0], [0], [1], [0, 0, 1, 1], [], []>} : vector<8x128xbf16>, vector<128x128xbf16>, vector<8x128xf32> -> vector<8x128xf32>
    %c3_87 = arith.constant 3 : index
    %c0_88 = arith.constant 0 : index
    %c0_89 = arith.constant 0 : index
    %165 = vector.load %arg15[%c3_87, %c0_88, %c0_89] : memref<4x1x128xf32, #tpu.memory_space<vmem>>, vector<1x1x128xf32>
    %166 = vector.shape_cast %165 : vector<1x1x128xf32> to vector<1x128xf32>
    %167 = vector.broadcast %166 : vector<1x128xf32> to vector<8x128xf32>
    %168 = arith.addf %164, %167 : vector<8x128xf32>
    %169 = arith.negf %168 : vector<8x128xf32>
    %170 = math.exp %169 : vector<8x128xf32>
    %cst_90 = arith.constant 1.000000e+00 : f32
    %171 = vector.broadcast %cst_90 : f32 to vector<8x128xf32>
    %172 = arith.addf %171, %170 : vector<8x128xf32>
    %173 = arith.divf %171, %172 : vector<8x128xf32>
    %174 = arith.mulf %168, %173 : vector<8x128xf32>
    %175 = vector.extract_strided_slice %55 {offsets = [0, 1024], sizes = [8, 256], strides = [1, 1]} : vector<8x1280xbf16> to vector<8x256xbf16>
    %c4 = arith.constant 4 : index
    %c0_91 = arith.constant 0 : index
    %c0_92 = arith.constant 0 : index
    %176 = vector.load %arg12[%c4, %c0_91, %c0_92] : memref<5x256x256xbf16, #tpu.memory_space<vmem>>, vector<1x256x256xbf16>
    %177 = vector.shape_cast %176 : vector<1x256x256xbf16> to vector<256x256xbf16>
    %cst_93 = arith.constant dense<0.000000e+00> : vector<8x256xf32>
    %178 = tpu.matmul %175, %177, %cst_93 {dimension_numbers = #tpu.dot_dimension_numbers<[1], [0], [0], [1], [0, 0, 1, 1], [], []>} : vector<8x256xbf16>, vector<256x256xbf16>, vector<8x256xf32> -> vector<8x256xf32>
    %c4_94 = arith.constant 4 : index
    %c0_95 = arith.constant 0 : index
    %c0_96 = arith.constant 0 : index
    %179 = vector.load %arg13[%c4_94, %c0_95, %c0_96] : memref<5x1x256xf32, #tpu.memory_space<vmem>>, vector<1x1x256xf32>
    %180 = vector.shape_cast %179 : vector<1x1x256xf32> to vector<1x256xf32>
    %181 = vector.broadcast %180 : vector<1x256xf32> to vector<8x256xf32>
    %182 = arith.addf %178, %181 : vector<8x256xf32>
    %183 = vector.extract_strided_slice %182 {offsets = [0, 0], sizes = [8, 128], strides = [1, 1]} : vector<8x256xf32> to vector<8x128xf32>
    %184 = vector.extract_strided_slice %182 {offsets = [0, 128], sizes = [8, 128], strides = [1, 1]} : vector<8x256xf32> to vector<8x128xf32>
    %cst_97 = arith.constant 1.000000e+00 : f32
    %185 = vector.broadcast %cst_97 : f32 to vector<8x128xf32>
    %186 = arith.addf %185, %183 : vector<8x128xf32>
    %187 = arith.mulf %174, %186 : vector<8x128xf32>
    %188 = arith.addf %187, %184 : vector<8x128xf32>
    %189 = arith.truncf %188 : vector<8x128xf32> to vector<8x128xbf16>
    %c0_98 = arith.constant 0 : index
    %c0_99 = arith.constant 0 : index
    %190 = vector.load %arg18[%c0_98, %c0_99] : memref<128x128xbf16, #tpu.memory_space<vmem>>, vector<128x128xbf16>
    %cst_100 = arith.constant dense<0.000000e+00> : vector<8x128xf32>
    %191 = tpu.matmul %189, %190, %cst_100 {dimension_numbers = #tpu.dot_dimension_numbers<[1], [0], [0], [1], [0, 0, 1, 1], [], []>} : vector<8x128xbf16>, vector<128x128xbf16>, vector<8x128xf32> -> vector<8x128xf32>
    %c0_101 = arith.constant 0 : index
    %c0_102 = arith.constant 0 : index
    %192 = vector.load %arg19[%c0_101, %c0_102] : memref<1x128xf32, #tpu.memory_space<vmem>>, vector<1x128xf32>
    %193 = vector.broadcast %192 : vector<1x128xf32> to vector<8x128xf32>
    %194 = arith.addf %191, %193 : vector<8x128xf32>
    %c0_103 = arith.constant 0 : index
    %c0_104 = arith.constant 0 : index
    %195 = vector.load %arg20[%c0_103, %c0_104] : memref<8x128xf32, #tpu.memory_space<vmem>>, vector<8x128xf32>
    tpu.vector_store %arg20[%c0_103, %c0_104], %194 {strides = array<i32>} : memref<8x128xf32, #tpu.memory_space<vmem>>, vector<8x128xf32>,
    return
  }
  func.func @transform_0(%arg0: i32) -> (i32, i32) {
    %c0_i32 = arith.constant 0 : i32
    %c0_i32_0 = arith.constant 0 : i32
    return %arg0, %c0_i32 : i32, i32
  }
  func.func @transform_1(%arg0: i32) -> (i32, i32) {
    %c0_i32 = arith.constant 0 : i32
    %c0_i32_0 = arith.constant 0 : i32
    return %arg0, %c0_i32 : i32, i32
  }
  func.func @transform_2(%arg0: i32) -> (i32, i32) {
    %c0_i32 = arith.constant 0 : i32
    %c0_i32_0 = arith.constant 0 : i32
    return %arg0, %c0_i32 : i32, i32
  }
  func.func @transform_3(%arg0: i32) -> (i32, i32) {
    %c0_i32 = arith.constant 0 : i32
    %c0_i32_0 = arith.constant 0 : i32
    %c0_i32_1 = arith.constant 0 : i32
    return %c0_i32, %c0_i32_0 : i32, i32
  }
  func.func @transform_4(%arg0: i32) -> (i32, i32) {
    %c0_i32 = arith.constant 0 : i32
    %c0_i32_0 = arith.constant 0 : i32
    %c0_i32_1 = arith.constant 0 : i32
    return %c0_i32, %c0_i32_0 : i32, i32
  }
  func.func @transform_5(%arg0: i32) -> (i32, i32) {
    %c0_i32 = arith.constant 0 : i32
    %c0_i32_0 = arith.constant 0 : i32
    %c0_i32_1 = arith.constant 0 : i32
    return %c0_i32, %c0_i32_0 : i32, i32
  }
  func.func @transform_6(%arg0: i32) -> (i32, i32) {
    %c0_i32 = arith.constant 0 : i32
    %c0_i32_0 = arith.constant 0 : i32
    %c0_i32_1 = arith.constant 0 : i32
    return %c0_i32, %c0_i32_0 : i32, i32
  }
  func.func @transform_7(%arg0: i32) -> (i32, i32) {
    %c0_i32 = arith.constant 0 : i32
    %c0_i32_0 = arith.constant 0 : i32
    %c0_i32_1 = arith.constant 0 : i32
    return %c0_i32, %c0_i32_0 : i32, i32
  }
  func.func @transform_8(%arg0: i32) -> (i32, i32) {
    %c0_i32 = arith.constant 0 : i32
    %c0_i32_0 = arith.constant 0 : i32
    %c0_i32_1 = arith.constant 0 : i32
    return %c0_i32, %c0_i32_0 : i32, i32
  }
  func.func @transform_9(%arg0: i32) -> (i32, i32) {
    %c0_i32 = arith.constant 0 : i32
    %c0_i32_0 = arith.constant 0 : i32
    %c0_i32_1 = arith.constant 0 : i32
    return %c0_i32, %c0_i32_0 : i32, i32
  }
  func.func @transform_10(%arg0: i32) -> (i32, i32) {
    %c0_i32 = arith.constant 0 : i32
    %c0_i32_0 = arith.constant 0 : i32
    %c0_i32_1 = arith.constant 0 : i32
    return %c0_i32, %c0_i32_0 : i32, i32
  }
  func.func @transform_11(%arg0: i32) -> (i32, i32, i32) {
    %c0_i32 = arith.constant 0 : i32
    %c0_i32_0 = arith.constant 0 : i32
    %c0_i32_1 = arith.constant 0 : i32
    %c0_i32_2 = arith.constant 0 : i32
    return %c0_i32, %c0_i32_0, %c0_i32_1 : i32, i32, i32
  }
  func.func @transform_12(%arg0: i32) -> (i32, i32, i32) {
    %c0_i32 = arith.constant 0 : i32
    %c0_i32_0 = arith.constant 0 : i32
    %c0_i32_1 = arith.constant 0 : i32
    %c0_i32_2 = arith.constant 0 : i32
    return %c0_i32, %c0_i32_0, %c0_i32_1 : i32, i32, i32
  }
  func.func @transform_13(%arg0: i32) -> (i32, i32, i32) {
    %c0_i32 = arith.constant 0 : i32
    %c0_i32_0 = arith.constant 0 : i32
    %c0_i32_1 = arith.constant 0 : i32
    %c0_i32_2 = arith.constant 0 : i32
    return %c0_i32, %c0_i32_0, %c0_i32_1 : i32, i32, i32
  }
  func.func @transform_14(%arg0: i32) -> (i32, i32, i32) {
    %c0_i32 = arith.constant 0 : i32
    %c0_i32_0 = arith.constant 0 : i32
    %c0_i32_1 = arith.constant 0 : i32
    %c0_i32_2 = arith.constant 0 : i32
    return %c0_i32, %c0_i32_0, %c0_i32_1 : i32, i32, i32
  }
  func.func @transform_15(%arg0: i32) -> (i32, i32) {
    %c0_i32 = arith.constant 0 : i32
    %c0_i32_0 = arith.constant 0 : i32
    %c0_i32_1 = arith.constant 0 : i32
    return %c0_i32, %c0_i32_0 : i32, i32
  }
  func.func @transform_16(%arg0: i32) -> (i32, i32) {
    %c0_i32 = arith.constant 0 : i32
    %c0_i32_0 = arith.constant 0 : i32
    %c0_i32_1 = arith.constant 0 : i32
    return %c0_i32, %c0_i32_0 : i32, i32
  }
  func.func @transform_17(%arg0: i32) -> (i32, i32) {
    %c0_i32 = arith.constant 0 : i32
    %c0_i32_0 = arith.constant 0 : i32
    %c0_i32_1 = arith.constant 0 : i32
    return %c0_i32, %c0_i32_0 : i32, i32
  }
  func.func @transform_18(%arg0: i32) -> (i32, i32) {
    %c0_i32 = arith.constant 0 : i32
    %c0_i32_0 = arith.constant 0 : i32
    %c0_i32_1 = arith.constant 0 : i32
    return %c0_i32, %c0_i32_0 : i32, i32
  }
  func.func @transform_19(%arg0: i32) -> (i32, i32) {
    %c0_i32 = arith.constant 0 : i32
    %c0_i32_0 = arith.constant 0 : i32
    return %arg0, %c0_i32 : i32, i32
  }
}

</mosaic_0001>

<bundles_post_ra>
// kernel: tpu_custom_call.1
= control target key start
LH: loop header
LB: loop body
LE: loop exit
PB: predicated region body
PF: predicated region fallthrough
CT: control target
= control target key end

     0   :  { %s5467_s0 = inlined_call_operand.vmem [shape: f32[8,1], index: 0, kind: input, shape index: {}]   ;;  %s5468_s1 = inlined_call_operand.vmem [shape: s32[8,1], index: 1, kind: input, shape index: {}]   ;;  %s5469_s2 = inlined_call_operand.hbm [shape: f32[8,128], index: 2, kind: input, shape index: {}]   ;;  %s5470_s3 = inlined_call_operand.hbm [shape: f32[1,128], index: 3, kind: input, shape index: {}]   ;;  %s5471_s4 = inlined_call_operand.hbm [shape: f32[2,128], index: 4, kind: input, shape index: {}]   ;;  %s5472_s5 = inlined_call_operand.hbm [shape: bf16[128,128], index: 5, kind: input, shape index: {}]   ;;  %s5473_s6 = inlined_call_operand.hbm [shape: f32[1,128], index: 6, kind: input, shape index: {}]   ;;  %s5474_s7 = inlined_call_operand.hbm [shape: bf16[128,128], index: 7, kind: input, shape index: {}]   ;;  %s5475_s8 = inlined_call_operand.hbm [shape: f32[1,128], index: 8, kind: input, shape index: {}]   ;;  %s5476_s9 = inlined_call_operand.hbm [shape: bf16[128,1280], index: 9, kind: input, shape index: {}]   ;;  %s5477_s10 = inlined_call_operand.vmem [shape: f32[1,1280], index: 10, kind: input, shape index: {}]   ;;  %s5478_s11 = inlined_call_operand.hbm [shape: bf16[5,256,256], index: 11, kind: input, shape index: {}]   ;;  %s5479_s12 = inlined_call_operand.hbm [shape: f32[5,1,256], index: 12, kind: input, shape index: {}]   ;;  %s5480_s13 = inlined_call_operand.hbm [shape: bf16[4,128,128], index: 13, kind: input, shape index: {}]   ;;  %s5481_s14 = inlined_call_operand.hbm [shape: f32[4,1,128], index: 14, kind: input, shape index: {}]   ;;  %s5482_s15 = inlined_call_operand.vmem [shape: bf16[128,128], index: 15, kind: input, shape index: {}]   ;;  %s5483_s16 = inlined_call_operand.vmem [shape: f32[1,128], index: 16, kind: input, shape index: {}]   ;;  %s5484_s17 = inlined_call_operand.hbm [shape: bf16[128,128], index: 17, kind: input, shape index: {}]   ;;  %s5485_s18 = inlined_call_operand.vmem [shape: f32[1,128], index: 18, kind: input, shape index: {}]   ;;  %s5486_s19 = inlined_call_operand.hbm [shape: f32[8,128], index: 19, kind: output, shape index: {}]  }
   0x1   :  { %5490 = sst [smem:[#allocation32_spill]] %s5467_s0 }
   0x2   :  { %5491 = sst [smem:[#allocation33_spill]] %s5468_s1 }
   0x3   :  { %5492 = sst [smem:[#allocation34_spill]] %s5469_s2 }
   0x4   :  { %5493 = sst [smem:[#allocation35_spill]] %s5470_s3 }
   0x5   :  { %5494 = sst [smem:[#allocation36_spill]] %s5486_s19 }
   0x6   :  { %24 = vsyncpa [#allocation3], 0 }
   0x7   :  { %25 = vsyncpa [#allocation6], 0 }
   0x8   :  { %26 = vsyncpa [#allocation9], 0 }
   0x9   :  { %27 = vsyncpa [#allocation12], 0 }
   0xa   :  { %28 = vsyncpa [#allocation15], 0 }
   0xb   :  { %29 = vsyncpa [#allocation18], 0 }
   0xc   :  { %30 = vsyncpa [#allocation21], 0 }
   0xd   :  { %31 = vsyncpa [#allocation4], 0  ;;  %s4919_s0 = smov [#allocation5]   ;;  %s4920_s20 = smov [#allocation8]  }
   0xe   :  { %s52_s30 = sshll.u32 %s4919_s0, 4  ;;  %s71_s21 = sshll.u32 %s4920_s20, 4  ;;  %s53_s30 = int_to_ptr.vmem [resolvable:$true] %s52_s30  ;;  %s5052_s21 = int_to_ptr.vmem [resolvable:$true] %s71_s21 }
   0xf   :  { %s5495_s2 = sld [smem:[#allocation35_spill]] }
  0x15   :  { %s4595_s23 = scalar_lea.hbm %s5495_s2, 16 }
  0x16   :  { %p4596_p0 = scmp.ne.s32.totalorder %s5495_s2, %s4595_s23  ;;  %p4599_p1 = scmp.lt.u32.totalorder %s4595_s23, %s5495_s2 }
  0x18   :  { %p4601_p2 = pnand %p4599_p1, %p4596_p0 }
  0x1a   :  { %4604 = shalt.err (!%p4601_p2)
}
  0x1b   :  { %s4605_s27 = scalar_lea.vmem %s53_s30, 16  ;;  %s4609_s28 = scalar_lea.vmem %s53_s30, 32 }
  0x1c   :  { %p4606_p3 = scmp.ne.s32.totalorder %s53_s30, %s4605_s27  ;;  %p4610_p4 = scmp.lt.s32.totalorder %s53_s30, %s53_s30 }
  0x1d   :  { %p4611_p5 = scmp.lt.s32.totalorder %s4609_s28, %s4605_s27 }
  0x1f   :  { %p4612_p6 = por %p4611_p5, %p4610_p4 }
  0x21   :  { %p4613_p7 = pnand %p4612_p6, %p4606_p3 }
  0x23   :  { %4616 = shalt.err (!%p4613_p7)
}
  0x24   :  { %55 = dma.hbm_to_vmem [thread:$0]  %s5495_s2, 16, %s53_s30, [#allocation6]  }
  0x25   :  { %s4617_s22 = scalar_lea.hbm %s5472_s5, 1024 }
  0x26   :  { %p4618_p8 = scmp.ne.s32.totalorder %s5472_s5, %s4617_s22  ;;  %p4621_p9 = scmp.lt.u32.totalorder %s4617_s22, %s5472_s5 }
  0x28   :  { %p4623_p10 = pnand %p4621_p9, %p4618_p8 }
  0x2a   :  { %4626 = shalt.err (!%p4623_p10)
}
  0x2b   :  { %s4627_s26 = scalar_lea.vmem %s5052_s21, 1024  ;;  %p4632_p12 = scmp.lt.s32.totalorder %s5052_s21, %s5052_s21 }
  0x2c   :  { %p4628_p11 = scmp.ne.s32.totalorder %s5052_s21, %s4627_s26  ;;  %p4633_p13 = scmp.lt.s32.totalorder %s4627_s26, %s4627_s26 }
  0x2e   :  { %p4634_p0 = por %p4633_p13, %p4632_p12 }
  0x30   :  { %p4635_p1 = pnand %p4634_p0, %p4628_p11 }
  0x32   :  { %4638 = shalt.err (!%p4635_p1)
}
  0x33   :  { %s4921_s30 = smov 64   ;;  %s4922_s2 = smov 4  }
  0x34   :  { %77 = dma.hbm_to_vmem [thread:$0]  %s5472_s5, 1024, %s5052_s21, [#allocation9], %s4921_s30, %s4921_s30, %s4922_s2  }
  0x35   :  { %s4923_s29 = smov [#allocation11]   ;;  %s4924_s20 = smov [#allocation14]  }
  0x36   :  { %s93_s0 = sshll.u32 %s4923_s29, 4  ;;  %s115_s1 = sshll.u32 %s4924_s20, 4  ;;  %s94_s0 = int_to_ptr.vmem [resolvable:$true] %s93_s0  ;;  %s5086_s1 = int_to_ptr.vmem [resolvable:$true] %s115_s1 }
  0x37   :  { %s4639_s23 = scalar_lea.hbm %s5474_s7, 1024 }
  0x38   :  { %p4640_p2 = scmp.ne.s32.totalorder %s5474_s7, %s4639_s23  ;;  %p4643_p3 = scmp.lt.u32.totalorder %s4639_s23, %s5474_s7 }
  0x3a   :  { %p4645_p4 = pnand %p4643_p3, %p4640_p2 }
  0x3c   :  { %4648 = shalt.err (!%p4645_p4)
}
  0x3d   :  { %s4649_s5 = scalar_lea.vmem %s94_s0, 1024  ;;  %p4654_p6 = scmp.lt.s32.totalorder %s94_s0, %s94_s0 }
  0x3e   :  { %p4650_p5 = scmp.ne.s32.totalorder %s94_s0, %s4649_s5  ;;  %p4655_p7 = scmp.lt.s32.totalorder %s4649_s5, %s4649_s5 }
  0x40   :  { %p4656_p8 = por %p4655_p7, %p4654_p6 }
  0x42   :  { %p4657_p9 = pnand %p4656_p8, %p4650_p5 }
  0x44   :  { %4660 = shalt.err (!%p4657_p9)
}
  0x45   :  { %99 = dma.hbm_to_vmem [thread:$0]  %s5474_s7, 1024, %s94_s0, [#allocation12], %s4921_s30, %s4921_s30, %s4922_s2  }
  0x46   :  { %s4661_s19 = scalar_lea.hbm %s5476_s9, 10240 }
  0x47   :  { %p4662_p10 = scmp.ne.s32.totalorder %s5476_s9, %s4661_s19  ;;  %p4665_p11 = scmp.lt.u32.totalorder %s4661_s19, %s5476_s9 }
  0x49   :  { %p4667_p12 = pnand %p4665_p11, %p4662_p10 }
  0x4b   :  { %4670 = shalt.err (!%p4667_p12)
}
  0x4c   :  { %s4671_s25 = scalar_lea.vmem %s5086_s1, 10240  ;;  %p4676_p0 = scmp.lt.s32.totalorder %s5086_s1, %s5086_s1 }
  0x4d   :  { %p4672_p13 = scmp.ne.s32.totalorder %s5086_s1, %s4671_s25  ;;  %p4677_p1 = scmp.lt.s32.totalorder %s4671_s25, %s4671_s25 }
  0x4f   :  { %p4678_p2 = por %p4677_p1, %p4676_p0 }
  0x51   :  { %p4679_p3 = pnand %p4678_p2, %p4672_p13 }
  0x53   :  { %4682 = shalt.err (!%p4679_p3)
}
  0x54   :  { %s4925_s7 = smov 640   ;;  %s4926_s0 = smov 40  }
  0x55   :  { %121 = dma.hbm_to_vmem [thread:$0]  %s5476_s9, 10240, %s5086_s1, [#allocation15], %s4925_s7, %s4925_s7, %s4926_s0  }
  0x56   :  { %s4927_s5 = smov [#allocation17]   ;;  %s4683_s29 = scalar_lea.hbm %s5479_s12, 160 }
  0x57   :  { %s141_s21 = sshll.u32 %s4927_s5, 4  ;;  %p4684_p4 = scmp.ne.s32.totalorder %s5479_s12, %s4683_s29  ;;  %s142_s21 = int_to_ptr.vmem [resolvable:$true] %s141_s21 }
  0x58   :  { %p4687_p5 = scmp.lt.u32.totalorder %s4683_s29, %s5479_s12 }
  0x5a   :  { %p4689_p6 = pnand %p4687_p5, %p4684_p4 }
  0x5c   :  { %4692 = shalt.err (!%p4689_p6)
}
  0x5d   :  { %s4693_s23 = scalar_lea.vmem %s142_s21, 160  ;;  %p4698_p8 = scmp.lt.s32.totalorder %s142_s21, %s142_s21 }
  0x5e   :  { %p4694_p7 = scmp.ne.s32.totalorder %s142_s21, %s4693_s23  ;;  %p4699_p9 = scmp.lt.s32.totalorder %s4693_s23, %s4693_s23 }
  0x60   :  { %p4700_p10 = por %p4699_p9, %p4698_p8 }
  0x62   :  { %p4701_p11 = pnand %p4700_p10, %p4694_p7 }
  0x64   :  { %4704 = shalt.err (!%p4701_p11)
}
  0x65   :  { %s4928_s9 = smov 32   ;;  %s4929_s1 = smov 2  }
  0x66   :  { %147 = dma.hbm_to_vmem [thread:$0]  %s5479_s12, 160, %s142_s21, [#allocation18], %s4928_s9, %s4928_s9, %s4929_s1  }
  0x67   :  { %s4930_s0 = smov [#allocation20]   ;;  %s4705_s27 = scalar_lea.hbm %s5481_s14, 64 }
  0x68   :  { %s165_s3 = sshll.u32 %s4930_s0, 4  ;;  %p4706_p12 = scmp.ne.s32.totalorder %s5481_s14, %s4705_s27  ;;  %s166_s3 = int_to_ptr.vmem [resolvable:$true] %s165_s3 }
  0x69   :  { %p4709_p13 = scmp.lt.u32.totalorder %s4705_s27, %s5481_s14 }
  0x6b   :  { %p4711_p0 = pnand %p4709_p13, %p4706_p12 }
  0x6d   :  { %4714 = shalt.err (!%p4711_p0)
}
  0x6e   :  { %s4715_s22 = scalar_lea.vmem %s166_s3, 64  ;;  %p4720_p2 = scmp.lt.s32.totalorder %s166_s3, %s166_s3 }
  0x6f   :  { %p4716_p1 = scmp.ne.s32.totalorder %s166_s3, %s4715_s22  ;;  %p4721_p3 = scmp.lt.s32.totalorder %s4715_s22, %s4715_s22 }
  0x71   :  { %p4722_p4 = por %p4721_p3, %p4720_p2 }
  0x73   :  { %p4723_p5 = pnand %p4722_p4, %p4716_p1 }
  0x75   :  { %4726 = shalt.err (!%p4723_p5)
}
  0x76   :  { %s4931_s12 = smov 16   ;;  %s4932_s21 = smov 1  }
  0x77   :  { %171 = dma.hbm_to_vmem [thread:$0]  %s5481_s14, 64, %s166_s3, [#allocation21], %s4931_s12, %s4931_s12, %s4932_s21  }
  0x78   :  { %s4933_s9 = smov [#allocation2]   ;;  %s4934_s25 = smov [#allocation7]  }
  0x79   :  { %s42_s1 = sshll.u32 %s4933_s9, 4  ;;  %s62_s7 = sshll.u32 %s4934_s25, 4  ;;  %s43_s1 = int_to_ptr.vmem [resolvable:$true] %s42_s1  ;;  %s63_s7 = int_to_ptr.vmem [resolvable:$true] %s62_s7 }
  0x7a   :  { %s5496_s5 = sld [smem:[#allocation34_spill]] }
  0x80   :  { %s4727_s27 = scalar_lea.hbm %s5496_s5, 128 }
  0x81   :  { %p4728_p6 = scmp.ne.s32.totalorder %s5496_s5, %s4727_s27  ;;  %p4731_p7 = scmp.lt.u32.totalorder %s4727_s27, %s5496_s5 }
  0x83   :  { %p4733_p8 = pnand %p4731_p7, %p4728_p6 }
  0x85   :  { %4736 = shalt.err (!%p4733_p8)
}
  0x86   :  { %s4737_s14 = scalar_lea.vmem %s43_s1, 128  ;;  %p4742_p10 = scmp.lt.s32.totalorder %s43_s1, %s43_s1 }
  0x87   :  { %p4738_p9 = scmp.ne.s32.totalorder %s43_s1, %s4737_s14  ;;  %p4743_p11 = scmp.lt.s32.totalorder %s4737_s14, %s4737_s14 }
  0x89   :  { %p4744_p12 = por %p4743_p11, %p4742_p10 }
  0x8b   :  { %p4745_p13 = pnand %p4744_p12, %p4738_p9 }
  0x8d   :  { %4748 = shalt.err (!%p4745_p13)
}
  0x8e   :  { %45 = dma.hbm_to_vmem [thread:$0]  %s5496_s5, 128, %s43_s1, [#allocation3]  }
  0x8f   :  { %s4749_s24 = scalar_lea.hbm %s5471_s4, 32 }
  0x90   :  { %p4750_p0 = scmp.ne.s32.totalorder %s5471_s4, %s4749_s24  ;;  %p4753_p1 = scmp.lt.u32.totalorder %s4749_s24, %s5471_s4 }
  0x92   :  { %p4755_p2 = pnand %p4753_p1, %p4750_p0 }
  0x94   :  { %4758 = shalt.err (!%p4755_p2)
}
  0x95   :  { %s4759_s26 = scalar_lea.vmem %s63_s7, 32  ;;  %p4764_p4 = scmp.lt.s32.totalorder %s63_s7, %s63_s7 }
  0x96   :  { %p4760_p3 = scmp.ne.s32.totalorder %s63_s7, %s4759_s26  ;;  %p4765_p5 = scmp.lt.s32.totalorder %s4759_s26, %s4759_s26 }
  0x98   :  { %p4766_p6 = por %p4765_p5, %p4764_p4 }
  0x9a   :  { %p4767_p7 = pnand %p4766_p6, %p4760_p3 }
  0x9c   :  { %4770 = shalt.err (!%p4767_p7)
}
  0x9d   :  { %65 = dma.hbm_to_vmem [thread:$0]  %s5471_s4, 32, %s63_s7, [#allocation6]  }
  0x9e   :  { %s4935_s27 = smov [#allocation10]   ;;  %s4936_s29 = smov [#allocation13]  }
  0x9f   :  { %s84_s28 = sshll.u32 %s4935_s27, 4  ;;  %s106_s19 = sshll.u32 %s4936_s29, 4  ;;  %s85_s28 = int_to_ptr.vmem [resolvable:$true] %s84_s28  ;;  %s107_s19 = int_to_ptr.vmem [resolvable:$true] %s106_s19 }
  0xa0   :  { %s4771_s3 = scalar_lea.hbm %s5473_s6, 16 }
  0xa1   :  { %p4772_p8 = scmp.ne.s32.totalorder %s5473_s6, %s4771_s3  ;;  %p4775_p9 = scmp.lt.u32.totalorder %s4771_s3, %s5473_s6 }
  0xa3   :  { %p4777_p10 = pnand %p4775_p9, %p4772_p8 }
  0xa5   :  { %4780 = shalt.err (!%p4777_p10)
}
  0xa6   :  { %s4781_s4 = scalar_lea.vmem %s85_s28, 16  ;;  %s4785_s7 = scalar_lea.vmem %s85_s28, 32 }
  0xa7   :  { %p4782_p11 = scmp.ne.s32.totalorder %s85_s28, %s4781_s4  ;;  %p4786_p12 = scmp.lt.s32.totalorder %s85_s28, %s85_s28 }
  0xa8   :  { %p4787_p13 = scmp.lt.s32.totalorder %s4785_s7, %s4781_s4 }
  0xaa   :  { %p4788_p0 = por %p4787_p13, %p4786_p12 }
  0xac   :  { %p4789_p1 = pnand %p4788_p0, %p4782_p11 }
  0xae   :  { %4792 = shalt.err (!%p4789_p1)
}
  0xaf   :  { %87 = dma.hbm_to_vmem [thread:$0]  %s5473_s6, 16, %s85_s28, [#allocation9]  }
  0xb0   :  { %s4793_s26 = scalar_lea.hbm %s5475_s8, 16 }
  0xb1   :  { %p4794_p2 = scmp.ne.s32.totalorder %s5475_s8, %s4793_s26  ;;  %p4797_p3 = scmp.lt.u32.totalorder %s4793_s26, %s5475_s8 }
  0xb3   :  { %p4799_p4 = pnand %p4797_p3, %p4794_p2 }
  0xb5   :  { %4802 = shalt.err (!%p4799_p4)
}
  0xb6   :  { %s4803_s20 = scalar_lea.vmem %s107_s19, 16  ;;  %s4807_s14 = scalar_lea.vmem %s107_s19, 32 }
  0xb7   :  { %p4804_p5 = scmp.ne.s32.totalorder %s107_s19, %s4803_s20  ;;  %p4808_p6 = scmp.lt.s32.totalorder %s107_s19, %s107_s19 }
  0xb8   :  { %p4809_p7 = scmp.lt.s32.totalorder %s4807_s14, %s4803_s20 }
  0xba   :  { %p4810_p8 = por %p4809_p7, %p4808_p6 }
  0xbc   :  { %p4811_p9 = pnand %p4810_p8, %p4804_p5 }
  0xbe   :  { %4814 = shalt.err (!%p4811_p9)
}
  0xbf   :  { %109 = dma.hbm_to_vmem [thread:$0]  %s5475_s8, 16, %s107_s19, [#allocation12]  }
  0xc0   :  { %s4937_s3 = smov [#allocation16]   ;;  %s4815_s24 = scalar_lea.hbm %s5478_s11, 20480 }
  0xc1   :  { %s129_s22 = sshll.u32 %s4937_s3, 4  ;;  %p4816_p10 = scmp.ne.s32.totalorder %s5478_s11, %s4815_s24  ;;  %s130_s22 = int_to_ptr.vmem [resolvable:$true] %s129_s22 }
  0xc2   :  { %p4819_p11 = scmp.lt.u32.totalorder %s4815_s24, %s5478_s11 }
  0xc4   :  { %p4821_p12 = pnand %p4819_p11, %p4816_p10 }
  0xc6   :  { %4824 = shalt.err (!%p4821_p12)
}
  0xc7   :  { %s4825_s25 = scalar_lea.vmem %s130_s22, 20480  ;;  %p4830_p0 = scmp.lt.s32.totalorder %s130_s22, %s130_s22 }
  0xc8   :  { %p4826_p13 = scmp.ne.s32.totalorder %s130_s22, %s4825_s25  ;;  %p4831_p1 = scmp.lt.s32.totalorder %s4825_s25, %s4825_s25 }
  0xca   :  { %p4832_p2 = por %p4831_p1, %p4830_p0 }
  0xcc   :  { %p4833_p3 = pnand %p4832_p2, %p4826_p13 }
  0xce   :  { %4836 = shalt.err (!%p4833_p3)
}
  0xcf   :  { %s4938_s8 = smov 128   ;;  %s4939_s19 = smov 8  }
  0xd0   :  { %135 = dma.hbm_to_vmem [thread:$0]  %s5478_s11, 20480, %s130_s22, [#allocation15], %s4938_s8, %s4938_s8, %s4939_s19  }
  0xd1   :  { %s4940_s1 = smov [#allocation19]   ;;  %s4941_s27 = smov [#allocation22]  }
  0xd2   :  { %s153_s5 = sshll.u32 %s4940_s1, 4  ;;  %s181_s29 = sshll.u32 %s4941_s27, 4  ;;  %s154_s5 = int_to_ptr.vmem [resolvable:$true] %s153_s5  ;;  %s182_s29 = int_to_ptr.vmem [resolvable:$true] %s181_s29 }
  0xd3   :  { %s4837_s6 = scalar_lea.hbm %s5480_s13, 4096 }
  0xd4   :  { %p4838_p4 = scmp.ne.s32.totalorder %s5480_s13, %s4837_s6  ;;  %p4841_p5 = scmp.lt.u32.totalorder %s4837_s6, %s5480_s13 }
  0xd6   :  { %p4843_p6 = pnand %p4841_p5, %p4838_p4 }
  0xd8   :  { %4846 = shalt.err (!%p4843_p6)
}
  0xd9   :  { %s4847_s11 = scalar_lea.vmem %s154_s5, 4096  ;;  %p4852_p8 = scmp.lt.s32.totalorder %s154_s5, %s154_s5 }
  0xda   :  { %p4848_p7 = scmp.ne.s32.totalorder %s154_s5, %s4847_s11  ;;  %p4853_p9 = scmp.lt.s32.totalorder %s4847_s11, %s4847_s11 }
  0xdc   :  { %p4854_p10 = por %p4853_p9, %p4852_p8 }
  0xde   :  { %p4855_p11 = pnand %p4854_p10, %p4848_p7 }
  0xe0   :  { %4858 = shalt.err (!%p4855_p11)
}
  0xe1   :  { %159 = dma.hbm_to_vmem [thread:$0]  %s5480_s13, 4096, %s154_s5, [#allocation18], %s4921_s30, %s4921_s30, %s4922_s2  }
  0xe2   :  { %s4859_s23 = scalar_lea.hbm %s5484_s17, 1024 }
  0xe3   :  { %p4860_p12 = scmp.ne.s32.totalorder %s5484_s17, %s4859_s23  ;;  %p4863_p13 = scmp.lt.u32.totalorder %s4859_s23, %s5484_s17 }
  0xe5   :  { %p4865_p0 = pnand %p4863_p13, %p4860_p12 }
  0xe7   :  { %4868 = shalt.err (!%p4865_p0)
}
  0xe8   :  { %s4869_s0 = scalar_lea.vmem %s182_s29, 1024  ;;  %p4874_p2 = scmp.lt.s32.totalorder %s182_s29, %s182_s29 }
  0xe9   :  { %p4870_p1 = scmp.ne.s32.totalorder %s182_s29, %s4869_s0  ;;  %p4875_p3 = scmp.lt.s32.totalorder %s4869_s0, %s4869_s0 }
  0xeb   :  { %p4876_p4 = por %p4875_p3, %p4874_p2 }
  0xed   :  { %p4877_p5 = pnand %p4876_p4, %p4870_p1 }
  0xef   :  { %4880 = shalt.err (!%p4877_p5)
}
  0xf0   :  { %187 = dma.hbm_to_vmem [thread:$0]  %s5484_s17, 1024, %s182_s29, [#allocation21], %s4921_s30, %s4921_s30, %s4922_s2  }
  0xf1   :  { %4903 = dma.done.wait [#allocation3], 128  }
  0xf2   :  { %4904 = vsyncadd [#allocation3], 4294967168 }
  0xf3   :  { %4905 = dma.done.wait [#allocation6], 48  }
  0xf4   :  { %4906 = vsyncadd [#allocation6], 4294967248 }
  0xf5   :  { %4907 = dma.done.wait [#allocation9], 1040  }
  0xf6   :  { %4908 = vsyncadd [#allocation9], 4294966256 }
  0xf7   :  { %4909 = dma.done.wait [#allocation12], 1040  }
  0xf8   :  { %4910 = vsyncadd [#allocation12], 4294966256 }
  0xf9   :  { %4911 = dma.done.wait [#allocation15], 30720  }
  0xfa   :  { %4912 = vsyncadd [#allocation15], 4294936576 }
  0xfb   :  { %4913 = dma.done.wait [#allocation18], 4256  }
  0xfc   :  { %4914 = vsyncadd [#allocation18], 4294963040 }
  0xfd   :  { %4915 = dma.done.wait [#allocation21], 1088  }
  0xfe   :  { %4916 = vsyncadd [#allocation21], 4294966208  ;;  %v4942_v0 = vmov 0   ;;  %s5497_s17 = sld [smem:[#allocation32_spill]]  ;;  %s5498_s27 = sld [smem:[#allocation33_spill]]  ;;  %v4107_v4 = vld [vmem:[#allocation8] sm:$0xff]  }
  0xff   :  { %4106 = vset.pattern.permute.xlu0 %v4942_v0  ;;  %v4943_v5 = vmov 0.0   ;;  %v4108_v6 = vld [vmem:[#allocation8 + $0x8] sm:$0xff]   ;;  %v4109_v7 = vld [vmem:[#allocation8 + $0x10] sm:$0xff]   ;;  %v4110_v8 = vld [vmem:[#allocation8 + $0x18] sm:$0xff]   ;;  %vm4944_vm1 = vmmov 0   ;;  %s4951_s1 = smov [#allocation23]  }
 0x100   :  { %3909 = vmatprep.subr.bf16.mxu0 %v4943_v5  ;;  %3929 = vmatprep.subr.bf16.mxu1 %v4943_v5  ;;  %v4111_v9 = vld [vmem:[#allocation8 + $0x20] sm:$0xff]   ;;  %v4112_v10 = vld [vmem:[#allocation8 + $0x28] sm:$0xff]   ;;  %v4113_v11 = vld [vmem:[#allocation8 + $0x30] sm:$0xff]   ;;  %v4945_v26 = vmov 683565275   ;;  %s3486_s5 = sshll.u32 %s4951_s1, 4  ;;  %s3487_s5 = int_to_ptr.vmem [resolvable:$true] %s3486_s5 }
 0x101   :  { %3910 = vmatpush3.bf16.msra.mxu0 %v4107_v4  ;;  %3925 = vmatprep.mubr.msk.bf16.mxu0 %vm4944_vm1, %v4943_v5  ;;  %v4114_v12 = vld [vmem:[#allocation8 + $0x38] sm:$0xff]   ;;  %v4946_v28 = vmov 2475754826   ;;  %v4947_v31 = vmov 2131351028   ;;  %p4886_p7 = scmp.lt.s32.totalorder %s3487_s5, %s3487_s5 }
 0x102   :  { %3911 = vmatprep.subr.bf16.mxu0 %v4943_v5  ;;  %3945 = vmatprep.mubr.msk.bf16.mxu1 %vm4944_vm1, %v4943_v5  ;;  %v3501_v13 = vld [vmem:[#allocation5] ss:$0 sm:$0xff]  ;;  %v4948_v34 = vmov 2102212464   ;;  %v4949_v37 = vmov 920167782  }
 0x103   :  { %v4950_v40 = vmov 1326507024  }
 0x104   :  { %v230_v1 = vld [vmem:[%s5497_s17] sm:$0xff]  ;;  %s4881_s17 = scalar_lea.vmem %s3487_s5, 128 }
 0x105   :  { %v687_v2 = vld [vmem:[%s5498_s27] sm:$0xff]  ;;  %234 = vperm.xlu0 %4106, %v230_v1   ;;  %3912 = vmatpush3.bf16.msra.mxu0 %v4108_v6  ;;  %p4882_p6 = scmp.ne.s32.totalorder %s3487_s5, %s4881_s17  ;;  %p4887_p8 = scmp.lt.s32.totalorder %s4881_s17, %s4881_s17 }
 0x106   :  { %vm688_vm0 = vcmp.eq.s32.totalorder %v687_v2, 0  ;;  %3913 = vmatprep.subr.bf16.mxu0 %v4943_v5 }
 0x107   :  { %v689_v3 = vsel %vm688_vm0, 1, %v4942_v0  ;;  %p4888_p9 = por %p4887_p8, %p4886_p7 }
 0x109   :  { %691 = vperm.xlu0 %4106, %v689_v3   ;;  %3914 = vmatpush3.bf16.msra.mxu0 %v4109_v7  ;;  %p4889_p10 = pnand %p4888_p9, %p4882_p6 }
 0x10a   :  { %3915 = vmatprep.subr.bf16.mxu0 %v4943_v5 }
 0x10d   :  { %3916 = vmatpush3.bf16.msra.mxu0 %v4110_v8 }
 0x10e   :  { %3917 = vmatprep.subr.bf16.mxu0 %v4943_v5 }
 0x111   :  { %3918 = vmatpush3.bf16.msra.mxu0 %v4111_v9 }
 0x112   :  { %3919 = vmatprep.subr.bf16.mxu0 %v4943_v5 }
 0x115   :  { %3920 = vmatpush3.bf16.msra.mxu0 %v4112_v10 }
 0x116   :  { %3921 = vmatprep.subr.bf16.mxu0 %v4943_v5 }
 0x119   :  { %3922 = vmatpush3.bf16.msra.mxu0 %v4113_v11 }
 0x11a   :  { %3923 = vmatprep.subr.bf16.mxu0 %v4943_v5 }
 0x11d   :  { %3924 = vmatpush3.bf16.msra.mxu0 %v4114_v12 }
 0x184   :  { %v235_v14 = vpop.permute.xlu0 %234 }
 0x185   :  { %v5255_v15 = vmul.f32 %v3501_v13, %v235_v14 }
 0x187   :  { %v250_v16 = vand.u32 2139095040, %v5255_v15  ;;  %v247_v20 = vand.u32 2147483647, %v5255_v15  ;;  %vm249_vm9 = vcmp.lt.s32.totalorder %v5255_v15, 0 }
 0x189   :  { %v251_v17 = vshrl.u32 %v250_v16, 23  ;;  %v254_v23 = vand.u32 8388607, %v247_v20  ;;  %vm248_vm10 = vcmp.le.f32.partialorder %v247_v20, 0.7853982 }
 0x18b   :  { %v3502_v18 = vadd.s32 4294967169, %v251_v17  ;;  %v255_v42 = vor.u32 8388608, %v254_v23 }
 0x18d   :  { %v257_v19 = vadd.s32 1, %v3502_v18  ;;  %v295_v56 = vshll.u32 %v255_v42, 8 }
 0x18f   :  { %vm258_vm2 = vcmp.gt.s32.totalorder %v257_v19, 0 }
 0x190   :  { %v259_v21 = vsel %vm258_vm2, %v257_v19, 0 }
 0x191   :  { %v261_v22 = vand.u32 31, %v259_v21  ;;  %v260_v25 = vshrl.u32 %v259_v21, 5 }
 0x193   :  { %v262_v24 = vsub.s32 32, %v261_v22  ;;  %v264_v27 = vshll.u32 %v4945_v26, %v261_v22  ;;  %v267_v29 = vshll.u32 %v4946_v28, %v261_v22  ;;  %v270_v33 = vshll.u32 %v4947_v31, %v261_v22 }
 0x194   :  { %v273_v36 = vshll.u32 %v4948_v34, %v261_v22  ;;  %v276_v39 = vshll.u32 %v4949_v37, %v261_v22  ;;  %vm279_vm3 = vcmp.lt.s32.totalorder %v260_v25, 1  ;;  %vm282_vm4 = vcmp.lt.s32.totalorder %v260_v25, 4 }
 0x195   :  { %v265_v30 = vshrl.u32 %v4946_v28, %v262_v24  ;;  %v268_v32 = vshrl.u32 %v4947_v31, %v262_v24  ;;  %v271_v35 = vshrl.u32 %v4948_v34, %v262_v24  ;;  %v274_v38 = vshrl.u32 %v4949_v37, %v262_v24 }
 0x196   :  { %v277_v41 = vshrl.u32 %v4950_v40, %v262_v24  ;;  %v263_v51 = vshrl.u32 %v4945_v26, %v262_v24  ;;  %vm281_vm5 = vcmp.lt.s32.totalorder %v260_v25, 3  ;;  %vm280_vm6 = vcmp.lt.s32.totalorder %v260_v25, 2 }
 0x197   :  { %v266_v43 = vor.u32 %v265_v30, %v264_v27  ;;  %v269_v44 = vor.u32 %v268_v32, %v267_v29  ;;  %v272_v45 = vor.u32 %v271_v35, %v270_v33  ;;  %v275_v46 = vor.u32 %v274_v38, %v273_v36 }
 0x198   :  { %v278_v47 = vor.u32 %v277_v41, %v276_v39  ;;  %v244_v38 = vlaneseq }
 0x199   :  { %v284_v48 = vsel %vm282_vm4, %v272_v45, 2102212464  ;;  %v287_v49 = vsel %vm279_vm3, %v266_v43, %v269_v44  ;;  %v291_v50 = vsel %vm279_vm3, %v269_v44, %v272_v45  ;;  %v288_v52 = vsel %vm282_vm4, %v275_v46, 920167782 }
 0x19a   :  { %v292_v53 = vsel %vm282_vm4, %v278_v47, 1326507024  ;;  %v289_v54 = vsel %vm281_vm5, %v272_v45, %v288_v52  ;;  %v283_v57 = vsel %vm279_vm3, %v263_v51, %v266_v43  ;;  %v285_v58 = vsel %vm281_vm5, %v269_v44, %v284_v48 }
 0x19b   :  { %v293_v55 = vsel %vm281_vm5, %v275_v46, %v292_v53  ;;  %v290_v59 = vsel %vm280_vm6, %v287_v49, %v289_v54  ;;  %v286_v2 = vsel %vm280_vm6, %v283_v57, %v285_v58  ;;  %v245_v39 = vand.u32 127, %v244_v38  ;;  %v4117_v57 = vld [vmem:[#allocation11 + $0x10] sm:$0xff]   ;;  %v4119_v58 = vld [vmem:[#allocation11 + $0x20] sm:$0xff]  }
 0x19c   :  { %v294_v60 = vsel %vm280_vm6, %v291_v50, %v293_v55  ;;  %v5264_v63 = vmul.u32.u64.low %v295_v56, %v290_v59  ;;  %v5265_v1 = vmul.u32.u64.high %v295_v56, %v290_v59, %v5264_v63  ;;  %v302_v4 = vmul.u32 %v295_v56, %v286_v2  ;;  %v4115_v55 = vld [vmem:[#allocation11] sm:$0xff]   ;;  %v4120_v59 = vld [vmem:[#allocation11 + $0x28] sm:$0xff]  }
 0x19d   :  { %v5261_v61 = vmul.u32.u64.low %v295_v56, %v294_v60  ;;  %v5262_v62 = vmul.u32.u64.high %v295_v56, %v294_v60, %v5261_v61  ;;  %vm246_vm11 = vcmp.lt.s32.totalorder %v245_v39, 64  ;;  %vm339_vm3 = vweird.f32 %v5255_v15  ;;  %3930 = vmatpush3.bf16.msra.mxu1 %v4115_v55  ;;  %v4116_v56 = vld [vmem:[#allocation11 + $0x8] sm:$0xff]   ;;  %v4121_v60 = vld [vmem:[#allocation11 + $0x30] sm:$0xff]   ;;  %v3520_v55 = vld [vmem:[#allocation13] ss:$0 sm:$0xff] }
 0x19e   :  { %v305_v3 = vadd.s32 1, %v5265_v1  ;;  %3931 = vmatprep.subr.bf16.mxu1 %v4943_v5  ;;  %v4122_v61 = vld [vmem:[#allocation11 + $0x38] sm:$0xff]  }
 0x19f   :  { %vm304_vm7 = vc.u32 %v5262_v62, %v5264_v63  ;;  %v303_v18 = vadd.s32 %v5264_v63, %v5262_v62  ;;  %v4123_v62 = vld [vmem:[#allocation14] ss:$40 sps:$4 sm:$0xff]   ;;  %v4125_v63 = vld [vmem:[#allocation14 + $0x4] ss:$40 sps:$4 sm:$0xff]   ;;  %v4131_v2 = vld [vmem:[#allocation14 + $0x54] ss:$40 sps:$4 sm:$0xff]  }
 0x1a0   :  { %v306_v6 = vsel %vm304_vm7, %v305_v3, %v5265_v1  ;;  %v4128_v1 = vld [vmem:[#allocation14 + $0xc] ss:$40 sps:$4 sm:$0xff]   ;;  %1239 = vmatprep.subr.bf16.mxu0 %v4125_v63  ;;  %v4129_v3 = vld [vmem:[#allocation14 + $0x50] ss:$40 sps:$4 sm:$0xff]   ;;  %v4158_v39 = vld [vmem:[#allocation14 + $0x19c] ss:$40 sps:$4 sm:$0xff]  }
 0x1a1   :  { %v307_v7 = vadd.s32 %v306_v6, %v302_v4  ;;  %3932 = vmatpush3.bf16.msra.mxu1 %v4116_v56  ;;  %v4137_v4 = vld [vmem:[#allocation14 + $0xa4] ss:$40 sps:$4 sm:$0xff]   ;;  %v4135_v6 = vld [vmem:[#allocation14 + $0xa0] ss:$40 sps:$4 sm:$0xff]  }
 0x1a2   :  { %3933 = vmatprep.subr.bf16.mxu1 %v4943_v5 }
 0x1a3   :  { %v308_v8 = vadd.s32 536870912, %v307_v7 }
 0x1a5   :  { %v309_v9 = vshrl.u32 %v308_v8, 30  ;;  %3934 = vmatpush3.bf16.msra.mxu1 %v4117_v57  ;;  %v4141_v8 = vld [vmem:[#allocation14 + $0xf0] ss:$40 sps:$4 sm:$0xff]  }
 0x1a6   :  { %3935 = vmatprep.subr.bf16.mxu1 %v4943_v5 }
 0x1a7   :  { %v310_v10 = vshll.u32 %v309_v9, 30  ;;  %v333_v31 = vsub.s32 4, %v309_v9 }
 0x1a9   :  { %v311_v11 = vsub.s32 %v307_v7, %v310_v10  ;;  %v334_v34 = vsel %vm249_vm9, %v333_v31, %v309_v9  ;;  %v4143_v7 = vld [vmem:[#allocation14 + $0xf4] ss:$40 sps:$4 sm:$0xff]   ;;  %v4149_v9 = vld [vmem:[#allocation14 + $0x144] ss:$40 sps:$4 sm:$0xff]   ;;  %v4147_v10 = vld [vmem:[#allocation14 + $0x140] ss:$40 sps:$4 sm:$0xff]  }
 0x1aa   :  { %v336_v36 = vsel %vm248_vm10, 0, %v334_v34  ;;  %v4132_v31 = vld [vmem:[#allocation14 + $0x58] ss:$40 sps:$4 sm:$0xff]   ;;  %v4146_v34 = vld [vmem:[#allocation14 + $0xfc] ss:$40 sps:$4 sm:$0xff]  }
 0x1ab   :  { %v313_v12 = vsub.s32 0, %v311_v11  ;;  %v443_v37 = vadd.s32 3, %v336_v36  ;;  %v340_v40 = vand.u32 3, %v336_v36  ;;  %v4152_v36 = vld [vmem:[#allocation14 + $0x14c] ss:$40 sps:$4 sm:$0xff]  }
 0x1ad   :  { %v3503_v13 = vmin.u32 %v313_v12, %v311_v11  ;;  %v444_v41 = vand.u32 3, %v443_v37  ;;  %vm345_vm12 = vcmp.eq.s32.totalorder %v340_v40, 2  ;;  %vm342_vm14 = vcmp.eq.s32.totalorder %v340_v40, 0  ;;  %v4153_v12 = vld [vmem:[#allocation14 + $0x190] ss:$40 sps:$4 sm:$0xff]  }
 0x1ae   :  { %vm341_vm0 = vcmp.lt.s32.totalorder %v340_v40, 2  ;;  %v4150_v37 = vld [vmem:[#allocation14 + $0x148] ss:$40 sps:$4 sm:$0xff]   ;;  %v4156_v40 = vld [vmem:[#allocation14 + $0x198] ss:$40 sps:$4 sm:$0xff]  }
 0x1af   :  { %v315_v14 = vclz %v3503_v13  ;;  %vm449_vm13 = vcmp.eq.s32.totalorder %v444_v41, 2  ;;  %vm446_vm15 = vcmp.eq.s32.totalorder %v444_v41, 0  ;;  %vm445_vm2 = vcmp.lt.s32.totalorder %v444_v41, 2  ;;  %v4161_v13 = vld [vmem:[#allocation14 + $0x1e4] ss:$40 sps:$4 sm:$0xff]  }
 0x1b0   :  { %v4164_v41 = vld [vmem:[#allocation14 + $0x1ec] ss:$40 sps:$4 sm:$0xff]  }
 0x1b1   :  { %v3504_v16 = vadd.s32 4294967294, %v315_v14  ;;  %v4159_v14 = vld [vmem:[#allocation14 + $0x1e0] ss:$40 sps:$4 sm:$0xff]  }
 0x1b3   :  { %vm3505_vm8 = vcmp.lt.s32.totalorder %v3504_v16, 0 }
 0x1b4   :  { %v318_v17 = vsel %vm3505_vm8, 0, %v3504_v16  ;;  %v3510_v16 = vld [vmem:[#allocation10] ss:$0 sm:$0xff] }
 0x1b5   :  { %v319_v19 = vsub.s32 32, %v318_v17  ;;  %v323_v21 = vsub.s32 4294967266, %v318_v17  ;;  %v320_v22 = vshll.u32 %v311_v11, %v318_v17  ;;  %v4155_v11 = vld [vmem:[#allocation14 + $0x194] ss:$40 sps:$4 sm:$0xff]  }
 0x1b7   :  { %v321_v23 = vshrl.u32 %v303_v18, %v319_v19  ;;  %v324_v24 = vadd.s32 127, %v323_v21 }
 0x1b9   :  { %v322_v25 = vor.u32 %v321_v23, %v320_v22  ;;  %v325_v26 = vshll.u32 %v324_v24, 23 }
 0x1bb   :  { %v326_v27 = vor.u32 4788187, %v325_v26  ;;  %v329_v29 = vcvt.s32.f32 %v322_v25 }
 0x1bd   :  { %v327_v28 = vand.u32 2147483647, %v326_v27 }
 0x1bf   :  { %v330_v30 = vmul.f32 %v329_v29, %v327_v28  ;;  %v4126_v28 = vld [vmem:[#allocation14 + $0x8] ss:$40 sps:$4 sm:$0xff]  }
 0x1c1   :  { %v331_v32 = vxor.u32 2147483648, %v330_v30 }
 0x1c3   :  { %v332_v33 = vsel %vm249_vm9, %v331_v32, %v330_v30  ;;  %v4134_v30 = vld [vmem:[#allocation14 + $0x5c] ss:$40 sps:$4 sm:$0xff]   ;;  %v4140_v32 = vld [vmem:[#allocation14 + $0xac] ss:$40 sps:$4 sm:$0xff]  }
 0x1c4   :  { %v335_v35 = vsel %vm248_vm10, %v5255_v15, %v332_v33  ;;  %v4118_v15 = vld [vmem:[#allocation11 + $0x18] sm:$0xff]   ;;  %v4138_v33 = vld [vmem:[#allocation14 + $0xa8] ss:$40 sps:$4 sm:$0xff]  }
 0x1c5   :  { %4531 = vcosq.f32 %v335_v35  ;;  %3936 = vmatpush3.bf16.msra.mxu1 %v4118_v15 }
 0x1c6   :  { %4533 = vsinq.f32 %v335_v35  ;;  %3937 = vmatprep.subr.bf16.mxu1 %v4943_v5  ;;  %v4144_v35 = vld [vmem:[#allocation14 + $0xf8] ss:$40 sps:$4 sm:$0xff]  }
 0x1c9   :  { %3938 = vmatpush3.bf16.msra.mxu1 %v4119_v58 }
 0x1ca   :  { %3939 = vmatprep.subr.bf16.mxu1 %v4943_v5 }
 0x1cd   :  { %3940 = vmatpush3.bf16.msra.mxu1 %v4120_v59 }
 0x1ce   :  { %3941 = vmatprep.subr.bf16.mxu1 %v4943_v5 }
 0x1cf   :  { %v4532_v42 = vpop.eup %4531 }
 0x1d0   :  { %v4534_v43 = vpop.eup %4533  ;;  %v346_v44 = vxor.u32 2147483648, %v4532_v42 }
 0x1d1   :  { %v343_v45 = vxor.u32 2147483648, %v4534_v43  ;;  %3942 = vmatpush3.bf16.msra.mxu1 %v4121_v60 }
 0x1d2   :  { %v347_v20 = vsel %vm345_vm12, %v346_v44, %v4534_v43  ;;  %v451_v46 = vsel %vm449_vm13, %v346_v44, %v4534_v43  ;;  %3943 = vmatprep.subr.bf16.mxu1 %v4943_v5  ;;  %v4167_v43 = vld [vmem:[#allocation14 + $0x234] ss:$40 sps:$4 sm:$0xff]  }
 0x1d3   :  { %v344_v47 = vsel %vm342_vm14, %v4532_v42, %v343_v45  ;;  %v448_v48 = vsel %vm446_vm15, %v4532_v42, %v343_v45  ;;  %v4162_v42 = vld [vmem:[#allocation14 + $0x1e8] ss:$40 sps:$4 sm:$0xff]   ;;  %v4170_v44 = vld [vmem:[#allocation14 + $0x23c] ss:$40 sps:$4 sm:$0xff]  }
 0x1d4   :  { %v348_v49 = vsel %vm341_vm0, %v344_v47, %v347_v20  ;;  %v452_v50 = vsel %vm445_vm2, %v448_v48, %v451_v46  ;;  %v4165_v45 = vld [vmem:[#allocation14 + $0x230] ss:$40 sps:$4 sm:$0xff]   ;;  %v4173_v46 = vld [vmem:[#allocation14 + $0x14] ss:$40 sps:$4 sm:$0xff]   ;;  %v5288_v48 = vshrl.u32 %v244_v38, 7 }
 0x1d5   :  { %v349_v51 = vsel %vm339_vm3, nan, %v348_v49  ;;  %v453_v52 = vsel %vm339_vm3, nan, %v452_v50  ;;  %3944 = vmatpush3.bf16.msra.mxu1 %v4122_v61  ;;  %v4168_v20 = vld [vmem:[#allocation14 + $0x238] ss:$40 sps:$4 sm:$0xff]   ;;  %v4176_v47 = vld [vmem:[#allocation14 + $0x1c] ss:$40 sps:$4 sm:$0xff]  }
 0x1d6   :  { %v454_v53 = vsel %vm246_vm11, %v349_v51, %v453_v52  ;;  %1280 = vmatprep.subr.bf16.mxu1 %v4128_v1  ;;  %v5291_v49 = vsub.s32 0, %v5288_v48  ;;  %v5294_v50 = vsub.s32 1, %v5288_v48  ;;  %v686_v51 = vld [vmem:[#allocation7] sm:$0x3]  ;;  %v692_v52 = vpop.permute.xlu0 %691  ;;  %v4179_v1 = vld [vmem:[#allocation14 + $0x64] ss:$40 sps:$4 sm:$0xff]  }
 0x1d7   :  { %v455_v54 = vpack.c.bf16 %v454_v53, %v454_v53  ;;  %vm693_vm4 = vcmp.eq.s32.totalorder %v692_v52, 1  ;;  %v4171_v61 = vld [vmem:[#allocation14 + $0x10] ss:$40 sps:$4 sm:$0xff]   ;;  %v4248_v52 = vld [vmem:[#allocation16 + $0x14] ss:$8 sps:$4 sm:$0xff]  }
 0x1d8   :  { %v697_v53 = vrot.slane %v686_v51, %v5291_v49 }
 0x1d9   :  { %3926 = vmatmul.mubr.bf16.vlgmr.msra.gmra.mrb[0].mxu0 %v455_v54  ;;  %v701_v54 = vrot.slane %v686_v51, %v5294_v50  ;;  %v4243_v51 = vld [vmem:[#allocation16] ss:$8 sps:$4 sm:$0xff]  }
 0x1da   :  { %1271 = vmatprep.mubr.bf16.mxu0 %v4942_v0  ;;  %1240 = vmatpush1.bf16.msra.mxu0 %v4123_v62  ;;  %v4174_v62 = vld [vmem:[#allocation14 + $0x18] ss:$40 sps:$4 sm:$0xff]  }
 0x1db   :  { %1241 = vmatprep.subr.bf16.mxu0 %v4131_v2  ;;  %v702_v58 = vsel %vm693_vm4, %v697_v53, %v701_v54  ;;  %v4182_v2 = vld [vmem:[#allocation14 + $0x6c] ss:$40 sps:$4 sm:$0xff]   ;;  %v4246_v53 = vld [vmem:[#allocation16 + $0x10] ss:$8 sps:$4 sm:$0xff]  }
 0x1dc   :  { %v4251_v54 = vld [vmem:[#allocation16 + $0x24] ss:$8 sps:$4 sm:$0xff]  }
 0x1de   :  { %1242 = vmatpush1.bf16.msra.mxu0 %v4129_v3  ;;  %v4177_v3 = vld [vmem:[#allocation14 + $0x60] ss:$40 sps:$4 sm:$0xff]  }
 0x1df   :  { %1243 = vmatprep.subr.bf16.mxu0 %v4137_v4  ;;  %v4180_v4 = vld [vmem:[#allocation14 + $0x68] ss:$40 sps:$4 sm:$0xff]  }
 0x1e2   :  { %1244 = vmatpush1.bf16.msra.mxu0 %v4135_v6  ;;  %v4185_v6 = vld [vmem:[#allocation14 + $0xb4] ss:$40 sps:$4 sm:$0xff]  }
 0x1e3   :  { %1245 = vmatprep.subr.bf16.mxu0 %v4143_v7  ;;  %v4188_v7 = vld [vmem:[#allocation14 + $0xbc] ss:$40 sps:$4 sm:$0xff]  }
 0x1e6   :  { %1246 = vmatpush1.bf16.msra.mxu0 %v4141_v8  ;;  %v4183_v8 = vld [vmem:[#allocation14 + $0xb0] ss:$40 sps:$4 sm:$0xff]  }
 0x1e7   :  { %1247 = vmatprep.subr.bf16.mxu0 %v4149_v9  ;;  %v4186_v9 = vld [vmem:[#allocation14 + $0xb8] ss:$40 sps:$4 sm:$0xff]  }
 0x1ea   :  { %1248 = vmatpush1.bf16.msra.mxu0 %v4147_v10  ;;  %v4191_v10 = vld [vmem:[#allocation14 + $0x104] ss:$40 sps:$4 sm:$0xff]  }
 0x1eb   :  { %1249 = vmatprep.subr.bf16.mxu0 %v4155_v11  ;;  %v4194_v11 = vld [vmem:[#allocation14 + $0x10c] ss:$40 sps:$4 sm:$0xff]  }
 0x1ee   :  { %1250 = vmatpush1.bf16.msra.mxu0 %v4153_v12  ;;  %v4189_v12 = vld [vmem:[#allocation14 + $0x100] ss:$40 sps:$4 sm:$0xff]  }
 0x1ef   :  { %1251 = vmatprep.subr.bf16.mxu0 %v4161_v13  ;;  %v4192_v13 = vld [vmem:[#allocation14 + $0x108] ss:$40 sps:$4 sm:$0xff]  }
 0x1f2   :  { %1252 = vmatpush1.bf16.msra.mxu0 %v4159_v14  ;;  %v4197_v14 = vld [vmem:[#allocation14 + $0x154] ss:$40 sps:$4 sm:$0xff]  }
 0x1f3   :  { %1253 = vmatprep.subr.bf16.mxu0 %v4167_v43  ;;  %v4236_v43 = vld [vmem:[#allocation14 + $0x1b4] ss:$40 sps:$4 sm:$0xff]  }
 0x1f6   :  { %1254 = vmatpush1.bf16.msra.mxu0 %v4165_v45  ;;  %v4237_v45 = vld [vmem:[#allocation14 + $0x200] ss:$40 sps:$4 sm:$0xff]  }
 0x1f7   :  { %1321 = vmatprep.subr.bf16.mxu0 %v4173_v46  ;;  %v4240_v46 = vld [vmem:[#allocation14 + $0x250] ss:$40 sps:$4 sm:$0xff]  }
 0x2ac   :  { %v561_v17 = vpop.f32.mrb[0].mxu0 }
 0x2ad   :  { %v562_v18 = vadd.f32 %v3510_v16, %v561_v17  ;;  %v3927_v19 = vpop.f32.mrb[1].mxu0  ;;  %v4200_v16 = vld [vmem:[#allocation14 + $0x15c] ss:$40 sps:$4 sm:$0xff]   ;;  %v4195_v17 = vld [vmem:[#allocation14 + $0x150] ss:$40 sps:$4 sm:$0xff]  }
 0x2ae   :  { %v564_v21 = vpop.f32.mrb[2].mxu0  ;;  %v4203_v19 = vld [vmem:[#allocation14 + $0x1a4] ss:$40 sps:$4 sm:$0xff]  }
 0x2af   :  { %v3519_v22 = vmul.f32 -1.442695, %v562_v18  ;;  %v3928_v23 = vpop.f32.mrb[3].mxu0  ;;  %v4206_v21 = vld [vmem:[#allocation14 + $0x1ac] ss:$40 sps:$4 sm:$0xff]  }
 0x2b0   :  { %v4204_v23 = vld [vmem:[#allocation14 + $0x1a8] ss:$40 sps:$4 sm:$0xff]  }
 0x2b1   :  { %4535 = vpow2.f32 %v3519_v22  ;;  %v4201_v22 = vld [vmem:[#allocation14 + $0x1a0] ss:$40 sps:$4 sm:$0xff]  }
 0x2bb   :  { %v4536_v24 = vpop.eup %4535 }
 0x2bc   :  { %v570_v25 = vadd.f32 1.0, %v4536_v24  ;;  %v4209_v24 = vld [vmem:[#allocation14 + $0x1f4] ss:$40 sps:$4 sm:$0xff]  }
 0x2be   :  { %4537 = vrcp.f32 %v570_v25  ;;  %v4212_v25 = vld [vmem:[#allocation14 + $0x1fc] ss:$40 sps:$4 sm:$0xff]  }
 0x2c8   :  { %v4538_v26 = vpop.eup %4537 }
 0x2c9   :  { %v573_v27 = vmul.f32 %v4538_v26, %v562_v18  ;;  %v4198_v18 = vld [vmem:[#allocation14 + $0x158] ss:$40 sps:$4 sm:$0xff]  }
 0x2ca   :  { %v4207_v26 = vld [vmem:[#allocation14 + $0x1f0] ss:$40 sps:$4 sm:$0xff]  }
 0x2cb   :  { %v574_v29 = vpack.c.bf16 %v573_v27, %v573_v27  ;;  %v4210_v27 = vld [vmem:[#allocation14 + $0x1f8] ss:$40 sps:$4 sm:$0xff]  }
 0x2cd   :  { %3946 = vmatmul.mubr.bf16.vlgmr.msra.gmra.mrb[0].mxu1 %v574_v29  ;;  %v4218_v29 = vld [vmem:[#allocation14 + $0x24c] ss:$40 sps:$4 sm:$0xff]  }
 0x2ce   :  { %1281 = vmatpush1.bf16.msra.mxu1 %v4126_v28  ;;  %1312 = vmatprep.mubr.bf16.mxu1 %v4942_v0  ;;  %v4215_v28 = vld [vmem:[#allocation14 + $0x244] ss:$40 sps:$4 sm:$0xff]  }
 0x2cf   :  { %1282 = vmatprep.subr.bf16.mxu1 %v4134_v30  ;;  %v4213_v30 = vld [vmem:[#allocation14 + $0x240] ss:$40 sps:$4 sm:$0xff]  }
 0x2d2   :  { %1283 = vmatpush1.bf16.msra.mxu1 %v4132_v31  ;;  %v4216_v31 = vld [vmem:[#allocation14 + $0x248] ss:$40 sps:$4 sm:$0xff]  }
 0x2d3   :  { %1284 = vmatprep.subr.bf16.mxu1 %v4140_v32  ;;  %v4221_v32 = vld [vmem:[#allocation14 + $0x24] ss:$40 sps:$4 sm:$0xff]  }
 0x2d6   :  { %1285 = vmatpush1.bf16.msra.mxu1 %v4138_v33  ;;  %v4219_v33 = vld [vmem:[#allocation14 + $0x20] ss:$40 sps:$4 sm:$0xff]  }
 0x2d7   :  { %1286 = vmatprep.subr.bf16.mxu1 %v4146_v34  ;;  %v4224_v34 = vld [vmem:[#allocation14 + $0x74] ss:$40 sps:$4 sm:$0xff]  }
 0x2da   :  { %1287 = vmatpush1.bf16.msra.mxu1 %v4144_v35  ;;  %v4222_v35 = vld [vmem:[#allocation14 + $0x70] ss:$40 sps:$4 sm:$0xff]  }
 0x2db   :  { %1288 = vmatprep.subr.bf16.mxu1 %v4152_v36  ;;  %v4227_v36 = vld [vmem:[#allocation14 + $0xc4] ss:$40 sps:$4 sm:$0xff]  }
 0x2de   :  { %1289 = vmatpush1.bf16.msra.mxu1 %v4150_v37  ;;  %v4225_v37 = vld [vmem:[#allocation14 + $0xc0] ss:$40 sps:$4 sm:$0xff]  }
 0x2df   :  { %1290 = vmatprep.subr.bf16.mxu1 %v4158_v39  ;;  %v4230_v39 = vld [vmem:[#allocation14 + $0x114] ss:$40 sps:$4 sm:$0xff]  }
 0x2e2   :  { %1291 = vmatpush1.bf16.msra.mxu1 %v4156_v40  ;;  %v4228_v40 = vld [vmem:[#allocation14 + $0x110] ss:$40 sps:$4 sm:$0xff]  }
 0x2e3   :  { %1292 = vmatprep.subr.bf16.mxu1 %v4164_v41  ;;  %v4233_v41 = vld [vmem:[#allocation14 + $0x164] ss:$40 sps:$4 sm:$0xff]  }
 0x2e6   :  { %1293 = vmatpush1.bf16.msra.mxu1 %v4162_v42  ;;  %v4231_v42 = vld [vmem:[#allocation14 + $0x160] ss:$40 sps:$4 sm:$0xff]  }
 0x2e7   :  { %1294 = vmatprep.subr.bf16.mxu1 %v4170_v44  ;;  %v4234_v44 = vld [vmem:[#allocation14 + $0x1b0] ss:$40 sps:$4 sm:$0xff]  }
 0x2ea   :  { %1295 = vmatpush1.bf16.msra.mxu1 %v4168_v20  ;;  %v4242_v20 = vld [vmem:[#allocation14 + $0x254] ss:$40 sps:$4 sm:$0xff]  }
 0x2eb   :  { %1362 = vmatprep.subr.bf16.mxu1 %v4176_v47  ;;  %v4245_v47 = vld [vmem:[#allocation16 + $0x4] ss:$8 sps:$4 sm:$0xff]  }
 0x3a0   :  { %v680_v56 = vpop.f32.mrb[0].mxu1 }
 0x3a1   :  { %v681_v57 = vadd.f32 %v3520_v55, %v680_v56  ;;  %v3947_v15 = vpop.f32.mrb[1].mxu1  ;;  %v4249_v55 = vld [vmem:[#allocation16 + $0x20] ss:$8 sps:$4 sm:$0xff]   ;;  %v4254_v56 = vld [vmem:[#allocation16 + $0x34] ss:$8 sps:$4 sm:$0xff]  }
 0x3a2   :  { %v683_v38 = vpop.f32.mrb[2].mxu1  ;;  %v4257_v15 = vld [vmem:[#allocation16 + $0x44] ss:$8 sps:$4 sm:$0xff]  }
 0x3a3   :  { %v703_v59 = vadd.f32 %v702_v58, %v681_v57  ;;  %v3948_v60 = vpop.f32.mrb[3].mxu1  ;;  %v4252_v57 = vld [vmem:[#allocation16 + $0x30] ss:$8 sps:$4 sm:$0xff]   ;;  %v4255_v58 = vld [vmem:[#allocation16 + $0x40] ss:$8 sps:$4 sm:$0xff]  }
 0x3a4   :  { %v4260_v38 = vld [vmem:[#allocation16 + $0x54] ss:$8 sps:$4 sm:$0xff]   ;;  %v4263_v60 = vld [vmem:[#allocation16 + $0x64] ss:$8 sps:$4 sm:$0xff]  }
 0x3a5   :  { %v5298_v63 = vpack.c.bf16 %v703_v59, %v703_v59  ;;  %v4258_v59 = vld [vmem:[#allocation16 + $0x50] ss:$8 sps:$4 sm:$0xff]  }
 0x3a7   :  { %1272 = vmatmul.mubr.bf16.vlgmr.msra.gmra.mrb[4].mxu0 %v5298_v63  ;;  %1313 = vmatmul.mubr.bf16.vlgmr.msra.gmra.mrb[4].mxu1 %v5298_v63 }
 0x3a8   :  { %1322 = vmatpush1.bf16.msra.mxu0 %v4171_v61  ;;  %1363 = vmatpush1.bf16.msra.mxu1 %v4174_v62  ;;  %v4261_v61 = vld [vmem:[#allocation16 + $0x60] ss:$8 sps:$4 sm:$0xff]   ;;  %v4266_v62 = vld [vmem:[#allocation16 + $0x74] ss:$8 sps:$4 sm:$0xff]  }
 0x3a9   :  { %1323 = vmatprep.subr.bf16.mxu0 %v4179_v1  ;;  %1364 = vmatprep.subr.bf16.mxu1 %v4182_v2  ;;  %v4264_v1 = vld [vmem:[#allocation16 + $0x70] ss:$8 sps:$4 sm:$0xff]   ;;  %v4270_v2 = vld [vmem:[#allocation16 + $0x84] ss:$8 sps:$4 sm:$0xff]  }
 0x3aa   :  { %1353 = vmatprep.mubr.bf16.mxu0 %v4942_v0  ;;  %1394 = vmatprep.mubr.bf16.mxu1 %v4942_v0 }
 0x3ac   :  { %1324 = vmatpush1.bf16.msra.mxu0 %v4177_v3  ;;  %1365 = vmatpush1.bf16.msra.mxu1 %v4180_v4  ;;  %v4271_v3 = vld [vmem:[%s5482_s15 + $0x8] sm:$0xff]   ;;  %v4268_v4 = vld [vmem:[#allocation16 + $0x80] ss:$8 sps:$4 sm:$0xff]  }
 0x3ad   :  { %1325 = vmatprep.subr.bf16.mxu0 %v4185_v6  ;;  %1366 = vmatprep.subr.bf16.mxu1 %v4188_v7  ;;  %v4274_v6 = vld [vmem:[#allocation16 + $0x94] ss:$8 sps:$4 sm:$0xff]  }
 0x3ae   :  { %v4275_v7 = vld [vmem:[%s5482_s15 + $0x10] sm:$0xff]  }
 0x3b0   :  { %1326 = vmatpush1.bf16.msra.mxu0 %v4183_v8  ;;  %1367 = vmatpush1.bf16.msra.mxu1 %v4186_v9  ;;  %v4272_v8 = vld [vmem:[#allocation16 + $0x90] ss:$8 sps:$4 sm:$0xff]   ;;  %v4278_v9 = vld [vmem:[#allocation16 + $0xa4] ss:$8 sps:$4 sm:$0xff]  }
 0x3b1   :  { %1327 = vmatprep.subr.bf16.mxu0 %v4191_v10  ;;  %1368 = vmatprep.subr.bf16.mxu1 %v4194_v11  ;;  %v4279_v10 = vld [vmem:[%s5482_s15 + $0x18] sm:$0xff]  }
 0x3b2   :  { %v4276_v11 = vld [vmem:[#allocation16 + $0xa0] ss:$8 sps:$4 sm:$0xff]  }
 0x3b4   :  { %1328 = vmatpush1.bf16.msra.mxu0 %v4189_v12  ;;  %1369 = vmatpush1.bf16.msra.mxu1 %v4192_v13  ;;  %v4282_v12 = vld [vmem:[#allocation16 + $0xb4] ss:$8 sps:$4 sm:$0xff]   ;;  %v4283_v13 = vld [vmem:[%s5482_s15 + $0x20] sm:$0xff]  }
 0x3b5   :  { %1329 = vmatprep.subr.bf16.mxu0 %v4197_v14  ;;  %1370 = vmatprep.subr.bf16.mxu1 %v4200_v16  ;;  %v4280_v14 = vld [vmem:[#allocation16 + $0xb0] ss:$8 sps:$4 sm:$0xff]   ;;  %v4286_v16 = vld [vmem:[#allocation16 + $0xc4] ss:$8 sps:$4 sm:$0xff]  }
 0x3b8   :  { %1330 = vmatpush1.bf16.msra.mxu0 %v4195_v17  ;;  %1371 = vmatpush1.bf16.msra.mxu1 %v4198_v18  ;;  %v4287_v17 = vld [vmem:[%s5482_s15 + $0x28] sm:$0xff]   ;;  %v4284_v18 = vld [vmem:[#allocation16 + $0xc0] ss:$8 sps:$4 sm:$0xff]  }
 0x3b9   :  { %1331 = vmatprep.subr.bf16.mxu0 %v4203_v19  ;;  %1372 = vmatprep.subr.bf16.mxu1 %v4206_v21  ;;  %v4290_v19 = vld [vmem:[#allocation16 + $0xd4] ss:$8 sps:$4 sm:$0xff]  }
 0x3ba   :  { %v4291_v21 = vld [vmem:[%s5482_s15 + $0x30] sm:$0xff]  }
 0x3bc   :  { %1332 = vmatpush1.bf16.msra.mxu0 %v4201_v22  ;;  %1373 = vmatpush1.bf16.msra.mxu1 %v4204_v23  ;;  %v4288_v22 = vld [vmem:[#allocation16 + $0xd0] ss:$8 sps:$4 sm:$0xff]   ;;  %v4294_v23 = vld [vmem:[#allocation16 + $0xe4] ss:$8 sps:$4 sm:$0xff]  }
 0x3bd   :  { %1333 = vmatprep.subr.bf16.mxu0 %v4209_v24  ;;  %1374 = vmatprep.subr.bf16.mxu1 %v4212_v25  ;;  %v4295_v24 = vld [vmem:[%s5482_s15 + $0x38] sm:$0xff]  }
 0x3be   :  { %v4292_v25 = vld [vmem:[#allocation16 + $0xe0] ss:$8 sps:$4 sm:$0xff]  }
 0x3c0   :  { %1334 = vmatpush1.bf16.msra.mxu0 %v4207_v26  ;;  %1375 = vmatpush1.bf16.msra.mxu1 %v4210_v27  ;;  %v1524_v26 = vld [vmem:[#allocation2] sm:$0xff] }
 0x3c1   :  { %1335 = vmatprep.subr.bf16.mxu0 %v4215_v28  ;;  %1376 = vmatprep.subr.bf16.mxu1 %v4218_v29  ;;  %v4298_v27 = vld [vmem:[#allocation16 + $0xf4] ss:$8 sps:$4 sm:$0xff]   ;;  %v1525_v28 = vpack.c.bf16 %v1524_v26, %v1524_v26  ;;  %v4296_v29 = vld [vmem:[#allocation16 + $0xf0] ss:$8 sps:$4 sm:$0xff]   ;;  %v1669_v26 = vld [vmem:[#allocation17] sm:$0x3] }
 0x3c4   :  { %1336 = vmatpush1.bf16.msra.mxu0 %v4213_v30  ;;  %1377 = vmatpush1.bf16.msra.mxu1 %v4216_v31  ;;  %v4299_v30 = vld [vmem:[#allocation19] sm:$0xff]   ;;  %v4300_v31 = vld [vmem:[#allocation19 + $0x8] sm:$0xff]  }
 0x3c5   :  { %1403 = vmatprep.subr.bf16.mxu0 %v4221_v32  ;;  %3949 = vmatprep.subr.bf16.mxu1 %v4943_v5  ;;  %v4301_v32 = vld [vmem:[#allocation19 + $0x10] sm:$0xff]  }
 0x3c7   :  { %1354 = vmatmul.mubr.bf16.vlgmr.msra.gmra.mrb[8].mxu0 %v5298_v63  ;;  %1395 = vmatmul.mubr.bf16.vlgmr.msra.gmra.mrb[8].mxu1 %v5298_v63 }
 0x3c8   :  { %1404 = vmatpush1.bf16.msra.mxu0 %v4219_v33  ;;  %1435 = vmatprep.mubr.bf16.mxu0 %v4942_v0  ;;  %v4239_v0 = vld [vmem:[#allocation14 + $0x204] ss:$40 sps:$4 sm:$0xff]  }
 0x3c9   :  { %1405 = vmatprep.subr.bf16.mxu0 %v4224_v34  ;;  %3965 = vmatprep.mubr.msk.bf16.mxu1 %vm4944_vm1, %v4943_v5  ;;  %v4302_v33 = vld [vmem:[#allocation19 + $0x18] sm:$0xff]   ;;  %v4303_v34 = vld [vmem:[#allocation19 + $0x20] sm:$0xff]  }
 0x3cc   :  { %1406 = vmatpush1.bf16.msra.mxu0 %v4222_v35  ;;  %v4304_v35 = vld [vmem:[#allocation19 + $0x28] sm:$0xff]  }
 0x3cd   :  { %1407 = vmatprep.subr.bf16.mxu0 %v4227_v36  ;;  %v5354_v36 = vld [vmem:[%s5477_s10] sm:$0xff] }
 0x3d0   :  { %1408 = vmatpush1.bf16.msra.mxu0 %v4225_v37  ;;  %v792_v37 = vrot.slane %v5354_v36, %v5291_v49 }
 0x3d1   :  { %1409 = vmatprep.subr.bf16.mxu0 %v4230_v39  ;;  %v796_v39 = vrot.slane %v5354_v36, %v5294_v50 }
 0x3d4   :  { %1410 = vmatpush1.bf16.msra.mxu0 %v4228_v40 }
 0x3d5   :  { %1411 = vmatprep.subr.bf16.mxu0 %v4233_v41 }
 0x3d8   :  { %1412 = vmatpush1.bf16.msra.mxu0 %v4231_v42 }
 0x3d9   :  { %1413 = vmatprep.subr.bf16.mxu0 %v4236_v43 }
 0x3dc   :  { %1414 = vmatpush1.bf16.msra.mxu0 %v4234_v44 }
 0x3dd   :  { %1415 = vmatprep.subr.bf16.mxu0 %v4239_v0 }
 0x3e0   :  { %1416 = vmatpush1.bf16.msra.mxu0 %v4237_v45 }
 0x3e1   :  { %1417 = vmatprep.subr.bf16.mxu0 %v4242_v20 }
 0x3e4   :  { %1418 = vmatpush1.bf16.msra.mxu0 %v4240_v46 }
 0x3e5   :  { %1841 = vmatprep.subr.bf16.mxu0 %v4245_v47 }
 0x3e7   :  { %1436 = vmatmul.mubr.bf16.vlgmr.msra.gmra.mrb[12].mxu0 %v5298_v63  ;;  %v4267_v63 = vld [vmem:[%s5482_s15] sm:$0xff]  }
 0x3e8   :  { %1842 = vmatpush1.bf16.msra.mxu0 %v4243_v51  ;;  %3950 = vmatpush3.bf16.msra.mxu1 %v4267_v63 }
 0x3e9   :  { %1843 = vmatprep.subr.bf16.mxu0 %v4248_v52  ;;  %3951 = vmatprep.subr.bf16.mxu1 %v4943_v5 }
 0x3ec   :  { %1844 = vmatpush1.bf16.msra.mxu0 %v4246_v53  ;;  %3952 = vmatpush3.bf16.msra.mxu1 %v4271_v3 }
 0x3ed   :  { %1845 = vmatprep.subr.bf16.mxu0 %v4251_v54  ;;  %3953 = vmatprep.subr.bf16.mxu1 %v4943_v5 }
 0x3f0   :  { %1846 = vmatpush1.bf16.msra.mxu0 %v4249_v55  ;;  %3954 = vmatpush3.bf16.msra.mxu1 %v4275_v7 }
 0x3f1   :  { %1847 = vmatprep.subr.bf16.mxu0 %v4254_v56  ;;  %3955 = vmatprep.subr.bf16.mxu1 %v4943_v5 }
 0x3f4   :  { %1848 = vmatpush1.bf16.msra.mxu0 %v4252_v57  ;;  %3956 = vmatpush3.bf16.msra.mxu1 %v4279_v10 }
 0x3f5   :  { %1849 = vmatprep.subr.bf16.mxu0 %v4257_v15  ;;  %3957 = vmatprep.subr.bf16.mxu1 %v4943_v5 }
 0x3f8   :  { %1850 = vmatpush1.bf16.msra.mxu0 %v4255_v58  ;;  %3958 = vmatpush3.bf16.msra.mxu1 %v4283_v13 }
 0x3f9   :  { %1851 = vmatprep.subr.bf16.mxu0 %v4260_v38  ;;  %3959 = vmatprep.subr.bf16.mxu1 %v4943_v5 }
 0x3fc   :  { %1852 = vmatpush1.bf16.msra.mxu0 %v4258_v59  ;;  %3960 = vmatpush3.bf16.msra.mxu1 %v4287_v17  ;;  %v4306_v17 = vld [vmem:[#allocation19 + $0x38] sm:$0xff]  }
 0x3fd   :  { %1853 = vmatprep.subr.bf16.mxu0 %v4263_v60  ;;  %3961 = vmatprep.subr.bf16.mxu1 %v4943_v5 }
 0x400   :  { %1854 = vmatpush1.bf16.msra.mxu0 %v4261_v61  ;;  %3962 = vmatpush3.bf16.msra.mxu1 %v4291_v21 }
 0x401   :  { %1855 = vmatprep.subr.bf16.mxu0 %v4266_v62  ;;  %3963 = vmatprep.subr.bf16.mxu1 %v4943_v5 }
 0x404   :  { %1856 = vmatpush1.bf16.msra.mxu0 %v4264_v1  ;;  %3964 = vmatpush3.bf16.msra.mxu1 %v4295_v24 }
 0x405   :  { %1857 = vmatprep.subr.bf16.mxu0 %v4270_v2  ;;  %3969 = vmatprep.subr.bf16.mxu1 %v4943_v5 }
 0x407   :  { %3966 = vmatmul.mubr.bf16.vlgmr.msra.gmra.mrb[12].mxu1 %v1525_v28  ;;  %v3619_v28 = vld [vmem:[%s5483_s16] ss:$0 sm:$0xff] }
 0x408   :  { %1858 = vmatpush1.bf16.msra.mxu0 %v4268_v4  ;;  %3985 = vmatprep.mubr.msk.bf16.mxu1 %vm4944_vm1, %v4943_v5 }
 0x409   :  { %1859 = vmatprep.subr.bf16.mxu0 %v4274_v6  ;;  %3970 = vmatpush3.bf16.msra.mxu1 %v4299_v30 }
 0x40a   :  { %3971 = vmatprep.subr.bf16.mxu1 %v4943_v5 }
 0x40c   :  { %1860 = vmatpush1.bf16.msra.mxu0 %v4272_v8 }
 0x40d   :  { %1861 = vmatprep.subr.bf16.mxu0 %v4278_v9  ;;  %3972 = vmatpush3.bf16.msra.mxu1 %v4300_v31 }
 0x40e   :  { %3973 = vmatprep.subr.bf16.mxu1 %v4943_v5 }
 0x410   :  { %1862 = vmatpush1.bf16.msra.mxu0 %v4276_v11 }
 0x411   :  { %1863 = vmatprep.subr.bf16.mxu0 %v4282_v12  ;;  %3974 = vmatpush3.bf16.msra.mxu1 %v4301_v32  ;;  %v1678_v32 = vrot.slane %v1669_v26, %v5294_v50 }
 0x412   :  { %3975 = vmatprep.subr.bf16.mxu1 %v4943_v5 }
 0x414   :  { %1864 = vmatpush1.bf16.msra.mxu0 %v4280_v14  ;;  %v4305_v14 = vld [vmem:[#allocation19 + $0x30] sm:$0xff]  }
 0x415   :  { %1865 = vmatprep.subr.bf16.mxu0 %v4286_v16  ;;  %3976 = vmatpush3.bf16.msra.mxu1 %v4302_v33 }
 0x416   :  { %3977 = vmatprep.subr.bf16.mxu1 %v4943_v5 }
 0x418   :  { %1866 = vmatpush1.bf16.msra.mxu0 %v4284_v18  ;;  %v4309_v18 = vld [vmem:[#allocation16 + $0x104] ss:$8 sps:$4 sm:$0xff]  }
 0x419   :  { %1867 = vmatprep.subr.bf16.mxu0 %v4290_v19  ;;  %3978 = vmatpush3.bf16.msra.mxu1 %v4303_v34  ;;  %v803_v19 = vsub.s32 3, %v5288_v48 }
 0x41a   :  { %3979 = vmatprep.subr.bf16.mxu1 %v4943_v5 }
 0x41b   :  { %v804_v21 = vrot.slane %v5354_v36, %v803_v19  ;;  %v4345_v19 = vld [vmem:[#allocation16 + $0x1c4] ss:$8 sps:$4 sm:$0xff]  }
 0x41c   :  { %1868 = vmatpush1.bf16.msra.mxu0 %v4288_v22 }
 0x41d   :  { %1869 = vmatprep.subr.bf16.mxu0 %v4294_v23  ;;  %3980 = vmatpush3.bf16.msra.mxu1 %v4304_v35 }
 0x41e   :  { %3981 = vmatprep.subr.bf16.mxu1 %v4943_v5 }
 0x420   :  { %1870 = vmatpush1.bf16.msra.mxu0 %v4292_v25 }
 0x421   :  { %1871 = vmatprep.subr.bf16.mxu0 %v4298_v27  ;;  %3982 = vmatpush3.bf16.msra.mxu1 %v4305_v14  ;;  %v1674_v27 = vrot.slane %v1669_v26, %v5291_v49  ;;  %v4354_v26 = vld [vmem:[#allocation16 + $0x1f4] ss:$8 sps:$4 sm:$0xff]  }
 0x422   :  { %3983 = vmatprep.subr.bf16.mxu1 %v4943_v5 }
 0x424   :  { %1872 = vmatpush1.bf16.msra.mxu0 %v4296_v29 }
 0x425   :  { %3989 = vmatprep.subr.bf16.mxu0 %v4943_v5  ;;  %3984 = vmatpush3.bf16.msra.mxu1 %v4306_v17 }
 0x426   :  { %2210 = vmatprep.subr.bf16.mxu1 %v4309_v18  ;;  %v4340_v18 = vld [vmem:[#allocation16 + $0x1b0] ss:$8 sps:$4 sm:$0xff]  }
 0x47a   :  { %v1273_v40 = vpop.f32.mrb[4].mxu0  ;;  %v5361_v41 = vpop.f32.mrb[4].mxu1 }
 0x47b   :  { %v1274_v42 = vadd.f32 %v1273_v40, %v792_v37  ;;  %v1275_v43 = vpop.f32.mrb[5].mxu0  ;;  %v1316_v44 = vpop.f32.mrb[5].mxu1 }
 0x47c   :  { %v1276_v0 = vadd.f32 %v1275_v43, %v796_v39  ;;  %v1277_v45 = vpop.f32.mrb[6].mxu0  ;;  %v1318_v20 = vpop.f32.mrb[6].mxu1  ;;  %v1317_v22 = vadd.f32 %v1316_v44, %v804_v21  ;;  %v4343_v21 = vld [vmem:[#allocation16 + $0x1c0] ss:$8 sps:$4 sm:$0xff]  }
 0x47d   :  { %v3609_v46 = vmul.f32 -1.442695, %v1274_v42  ;;  %v1278_v47 = vpop.f32.mrb[7].mxu0  ;;  %v1319_v51 = vpop.f32.mrb[7].mxu1  ;;  %v4312_v20 = vld [vmem:[#allocation16 + $0x114] ss:$8 sps:$4 sm:$0xff]  }
 0x47e   :  { %v3610_v52 = vmul.f32 -1.442695, %v1276_v0  ;;  %v3612_v23 = vmul.f32 -1.442695, %v1317_v22  ;;  %v4310_v47 = vld [vmem:[#allocation16 + $0x110] ss:$8 sps:$4 sm:$0xff]  }
 0x47f   :  { %4539 = vpow2.f32 %v3609_v46  ;;  %v4315_v51 = vld [vmem:[#allocation16 + $0x124] ss:$8 sps:$4 sm:$0xff]  }
 0x480   :  { %4541 = vpow2.f32 %v3610_v52  ;;  %v4313_v52 = vld [vmem:[#allocation16 + $0x120] ss:$8 sps:$4 sm:$0xff]  }
 0x489   :  { %v4540_v53 = vpop.eup %4539 }
 0x48a   :  { %v1474_v54 = vadd.f32 1.0, %v4540_v53  ;;  %v4542_v55 = vpop.eup %4541  ;;  %v4318_v53 = vld [vmem:[#allocation16 + $0x134] ss:$8 sps:$4 sm:$0xff]  }
 0x48b   :  { %v1475_v56 = vadd.f32 1.0, %v4542_v55  ;;  %v4321_v55 = vld [vmem:[#allocation16 + $0x144] ss:$8 sps:$4 sm:$0xff]  }
 0x48c   :  { %4543 = vrcp.f32 %v1474_v54  ;;  %v4316_v54 = vld [vmem:[#allocation16 + $0x130] ss:$8 sps:$4 sm:$0xff]  }
 0x48d   :  { %4545 = vrcp.f32 %v1475_v56  ;;  %v799_v56 = vsub.s32 2, %v5288_v48 }
 0x48e   :  { %4547 = vpow2.f32 %v3612_v23  ;;  %v4346_v23 = vld [vmem:[#allocation16 + $0x1d0] ss:$8 sps:$4 sm:$0xff]  }
 0x496   :  { %v4544_v57 = vpop.eup %4543 }
 0x497   :  { %v4546_v15 = vpop.eup %4545  ;;  %v1504_v58 = vmul.f32 %v4544_v57, %v1274_v42  ;;  %v4319_v57 = vld [vmem:[#allocation16 + $0x140] ss:$8 sps:$4 sm:$0xff]  }
 0x498   :  { %v1505_v38 = vmul.f32 %v4546_v15, %v1276_v0  ;;  %v4548_v24 = vpop.eup %4547  ;;  %v4307_v0 = vld [vmem:[#allocation16 + $0x100] ss:$8 sps:$4 sm:$0xff]   ;;  %v4324_v15 = vld [vmem:[#allocation16 + $0x154] ss:$8 sps:$4 sm:$0xff]  }
 0x499   :  { %v1514_v1 = vpack.c.bf16 %v1504_v58, %v1504_v58  ;;  %v1477_v25 = vadd.f32 1.0, %v4548_v24  ;;  %v800_v58 = vrot.slane %v5354_v36, %v799_v56  ;;  %v4351_v24 = vld [vmem:[#allocation16 + $0x1e4] ss:$8 sps:$4 sm:$0xff]  }
 0x49a   :  { %v5363_v59 = vpop.f32.mrb[8].mxu0  ;;  %v5365_v60 = vpop.f32.mrb[8].mxu1  ;;  %v1515_v61 = vpack.c.bf16 %v1505_v38, %v1505_v38  ;;  %v4322_v38 = vld [vmem:[#allocation16 + $0x150] ss:$8 sps:$4 sm:$0xff]  }
 0x49b   :  { %v5367_v62 = vpop.f32.mrb[9].mxu0  ;;  %v5369_v63 = vpop.f32.mrb[9].mxu1  ;;  %4549 = vrcp.f32 %v1477_v25  ;;  %v4349_v25 = vld [vmem:[#allocation16 + $0x1e0] ss:$8 sps:$4 sm:$0xff]  }
 0x49c   :  { %v1359_v2 = vpop.f32.mrb[10].mxu0  ;;  %v1400_v3 = vpop.f32.mrb[10].mxu1  ;;  %1873 = vmatprep.mubr.bf16.mxu0 %v1515_v61  ;;  %v4327_v61 = vld [vmem:[#allocation16 + $0x164] ss:$8 sps:$4 sm:$0xff]  }
 0x49d   :  { %v1360_v4 = vpop.f32.mrb[11].mxu0  ;;  %v1401_v6 = vpop.f32.mrb[11].mxu1  ;;  %1874 = vmatmul.mubr.bf16.vlgmr.msra.gmra.mrb[16].mxu0 %v1514_v1  ;;  %v1315_v1 = vadd.f32 %v5361_v41, %v800_v58  ;;  %v4325_v2 = vld [vmem:[#allocation16 + $0x160] ss:$8 sps:$4 sm:$0xff]   ;;  %v4330_v3 = vld [vmem:[#allocation16 + $0x174] ss:$8 sps:$4 sm:$0xff]  }
 0x49e   :  { %4005 = vmatprep.mubr.msk.bf16.mxu0 %vm4944_vm1, %v4943_v5  ;;  %v4328_v6 = vld [vmem:[#allocation16 + $0x170] ss:$8 sps:$4 sm:$0xff]   ;;  %v4337_v41 = vld [vmem:[#allocation16 + $0x1a0] ss:$8 sps:$4 sm:$0xff]  }
 0x49f   :  { %v3611_v4 = vmul.f32 -1.442695, %v1315_v1  ;;  %v2038_v58 = vld [vmem:[#allocation17 + $0x2] sm:$0x3] }
 0x4a1   :  { %4551 = vpow2.f32 %v3611_v4 }
 0x4a5   :  { %v4550_v35 = vpop.eup %4549 }
 0x4a6   :  { %v1507_v43 = vmul.f32 %v4550_v35, %v1317_v22  ;;  %v4348_v22 = vld [vmem:[#allocation16 + $0x1d4] ss:$8 sps:$4 sm:$0xff]   ;;  %v4359_v35 = vld [vmem:[#allocation19 + $0x60] sm:$0xff]  }
 0x4a8   :  { %v1517_v46 = vpack.c.bf16 %v1507_v43, %v1507_v43 }
 0x4ab   :  { %v4552_v14 = vpop.eup %4551 }
 0x4ac   :  { %v1476_v17 = vadd.f32 1.0, %v4552_v14 }
 0x4ae   :  { %4553 = vrcp.f32 %v1476_v17 }
 0x4ba   :  { %v5373_v7 = vpop.f32.mrb[12].mxu0 }
 0x4bb   :  { %v5375_v8 = vpop.f32.mrb[13].mxu0 }
 0x4bc   :  { %v1441_v9 = vpop.f32.mrb[14].mxu0 }
 0x4bd   :  { %v1442_v10 = vpop.f32.mrb[15].mxu0  ;;  %v4333_v9 = vld [vmem:[#allocation16 + $0x184] ss:$8 sps:$4 sm:$0xff]  }
 0x4be   :  { %v4331_v10 = vld [vmem:[#allocation16 + $0x180] ss:$8 sps:$4 sm:$0xff]  }
 0x4da   :  { %v1631_v11 = vpop.f32.mrb[12].mxu1 }
 0x4db   :  { %v3967_v12 = vpop.f32.mrb[13].mxu1  ;;  %v1632_v30 = vadd.f32 %v3619_v28, %v1631_v11  ;;  %v4336_v11 = vld [vmem:[#allocation16 + $0x194] ss:$8 sps:$4 sm:$0xff]   ;;  %v4352_v28 = vld [vmem:[#allocation16 + $0x1f0] ss:$8 sps:$4 sm:$0xff]  }
 0x4dc   :  { %v1634_v13 = vpop.f32.mrb[14].mxu1  ;;  %v4334_v12 = vld [vmem:[#allocation16 + $0x190] ss:$8 sps:$4 sm:$0xff]  }
 0x4dd   :  { %v3968_v16 = vpop.f32.mrb[15].mxu1  ;;  %v4339_v13 = vld [vmem:[#allocation16 + $0x1a4] ss:$8 sps:$4 sm:$0xff]  }
 0x4de   :  { %v4342_v16 = vld [vmem:[#allocation16 + $0x1b4] ss:$8 sps:$4 sm:$0xff]  }
 0x570   :  { %v1875_v29 = vpop.f32.mrb[16].mxu0 }
 0x571   :  { %v1876_v31 = vadd.f32 %v1875_v29, %v1674_v27  ;;  %v1877_v33 = vpop.f32.mrb[17].mxu0  ;;  %v4554_v27 = vpop.eup %4553 }
 0x572   :  { %v1879_v34 = vpop.f32.mrb[18].mxu0  ;;  %v1878_v42 = vadd.f32 %v1877_v33, %v1678_v32  ;;  %v1506_v29 = vmul.f32 %v4554_v27, %v1315_v1  ;;  %v4356_v32 = vld [vmem:[#allocation19 + $0x48] sm:$0xff]   ;;  %v4357_v33 = vld [vmem:[#allocation19 + $0x50] sm:$0xff]   ;;  %v807_v27 = vsub.s32 4, %v5288_v48 }
 0x573   :  { %v1882_v37 = vadd.f32 1.0, %v1876_v31  ;;  %v1880_v39 = vpop.f32.mrb[19].mxu0  ;;  %v4355_v31 = vld [vmem:[#allocation19 + $0x40] sm:$0xff]   ;;  %v4358_v34 = vld [vmem:[#allocation19 + $0x58] sm:$0xff]  }
 0x574   :  { %3990 = vmatpush3.bf16.msra.mxu0 %v4355_v31  ;;  %v4361_v39 = vld [vmem:[#allocation19 + $0x70] sm:$0xff]  }
 0x575   :  { %v1883_v40 = vmul.f32 %v1882_v37, %v1632_v30  ;;  %v1516_v30 = vpack.c.bf16 %v1506_v29, %v1506_v29  ;;  %3991 = vmatprep.subr.bf16.mxu0 %v4943_v5  ;;  %v4360_v37 = vld [vmem:[#allocation19 + $0x68] sm:$0xff]  }
 0x576   :  { %v4380_v29 = vld [vmem:[#allocation16 + $0x254] ss:$8 sps:$4 sm:$0xff]   ;;  %v4378_v31 = vld [vmem:[#allocation16 + $0x250] ss:$8 sps:$4 sm:$0xff]  }
 0x577   :  { %v1884_v44 = vadd.f32 %v1883_v40, %v1878_v42  ;;  %v4362_v40 = vld [vmem:[#allocation19 + $0x78] sm:$0xff]  }
 0x578   :  { %3992 = vmatpush3.bf16.msra.mxu0 %v4356_v32  ;;  %v4365_v42 = vld [vmem:[#allocation16 + $0x204] ss:$8 sps:$4 sm:$0xff]  }
 0x579   :  { %v1885_v45 = vpack.c.bf16 %v1884_v44, %v1884_v44  ;;  %3993 = vmatprep.subr.bf16.mxu0 %v4943_v5  ;;  %v4383_v32 = vld [vmem:[#allocation16 + $0x264] ss:$8 sps:$4 sm:$0xff]  }
 0x57b   :  { %3986 = vmatmul.mubr.bf16.vlgmr.msra.gmra.mrb[16].mxu1 %v1885_v45 }
 0x57c   :  { %2211 = vmatpush1.bf16.msra.mxu1 %v4307_v0  ;;  %2242 = vmatprep.mubr.bf16.mxu1 %v1517_v46  ;;  %v3660_v46 = vld [vmem:[#allocation20] ss:$0 sm:$0xff] }
 0x57d   :  { %2212 = vmatprep.subr.bf16.mxu1 %v4312_v20  ;;  %3994 = vmatpush3.bf16.msra.mxu0 %v4357_v33  ;;  %v811_v20 = vsub.s32 5, %v5288_v48 }
 0x57e   :  { %3995 = vmatprep.subr.bf16.mxu0 %v4943_v5 }
 0x580   :  { %2213 = vmatpush1.bf16.msra.mxu1 %v4310_v47  ;;  %v812_v47 = vrot.slane %v5354_v36, %v811_v20  ;;  %v4398_v20 = vld [vmem:[#allocation16 + $0x2b4] ss:$8 sps:$4 sm:$0xff]  }
 0x581   :  { %2214 = vmatprep.subr.bf16.mxu1 %v4315_v51  ;;  %3996 = vmatpush3.bf16.msra.mxu0 %v4358_v34  ;;  %v4381_v34 = vld [vmem:[#allocation16 + $0x260] ss:$8 sps:$4 sm:$0xff]  }
 0x582   :  { %3997 = vmatprep.subr.bf16.mxu0 %v4943_v5 }
 0x584   :  { %2215 = vmatpush1.bf16.msra.mxu1 %v4313_v52  ;;  %v1358_v52 = vadd.f32 %v5367_v62, %v812_v47  ;;  %v4396_v47 = vld [vmem:[#allocation16 + $0x2b0] ss:$8 sps:$4 sm:$0xff]  }
 0x585   :  { %2216 = vmatprep.subr.bf16.mxu1 %v4318_v53  ;;  %3998 = vmatpush3.bf16.msra.mxu0 %v4359_v35  ;;  %v4386_v35 = vld [vmem:[#allocation16 + $0x274] ss:$8 sps:$4 sm:$0xff]  }
 0x586   :  { %3999 = vmatprep.subr.bf16.mxu0 %v4943_v5 }
 0x588   :  { %2217 = vmatpush1.bf16.msra.mxu1 %v4316_v54  ;;  %v3614_v54 = vmul.f32 -1.442695, %v1358_v52 }
 0x589   :  { %2218 = vmatprep.subr.bf16.mxu1 %v4321_v55  ;;  %4000 = vmatpush3.bf16.msra.mxu0 %v4360_v37 }
 0x58a   :  { %4001 = vmatprep.subr.bf16.mxu0 %v4943_v5 }
 0x58c   :  { %2219 = vmatpush1.bf16.msra.mxu1 %v4319_v57 }
 0x58d   :  { %2220 = vmatprep.subr.bf16.mxu1 %v4324_v15  ;;  %4002 = vmatpush3.bf16.msra.mxu0 %v4361_v39  ;;  %v4384_v39 = vld [vmem:[#allocation16 + $0x270] ss:$8 sps:$4 sm:$0xff]  }
 0x58e   :  { %4003 = vmatprep.subr.bf16.mxu0 %v4943_v5 }
 0x590   :  { %2221 = vmatpush1.bf16.msra.mxu1 %v4322_v38  ;;  %v2043_v38 = vrot.slane %v2038_v58, %v5291_v49 }
 0x591   :  { %2222 = vmatprep.subr.bf16.mxu1 %v4327_v61  ;;  %4004 = vmatpush3.bf16.msra.mxu0 %v4362_v40  ;;  %v4389_v40 = vld [vmem:[#allocation16 + $0x284] ss:$8 sps:$4 sm:$0xff]  }
 0x592   :  { %2581 = vmatprep.subr.bf16.mxu0 %v4365_v42  ;;  %v4387_v42 = vld [vmem:[#allocation16 + $0x280] ss:$8 sps:$4 sm:$0xff]  }
 0x594   :  { %2223 = vmatpush1.bf16.msra.mxu1 %v4325_v2 }
 0x595   :  { %2224 = vmatprep.subr.bf16.mxu1 %v4330_v3  ;;  %v2047_v3 = vrot.slane %v2038_v58, %v5294_v50  ;;  %v4408_v58 = vld [vmem:[#allocation16 + $0x2f0] ss:$8 sps:$4 sm:$0xff]  }
 0x598   :  { %2225 = vmatpush1.bf16.msra.mxu1 %v4328_v6 }
 0x599   :  { %2226 = vmatprep.subr.bf16.mxu1 %v4333_v9 }
 0x59c   :  { %2227 = vmatpush1.bf16.msra.mxu1 %v4331_v10 }
 0x59d   :  { %2228 = vmatprep.subr.bf16.mxu1 %v4336_v11 }
 0x5a0   :  { %2229 = vmatpush1.bf16.msra.mxu1 %v4334_v12 }
 0x5a1   :  { %2230 = vmatprep.subr.bf16.mxu1 %v4339_v13 }
 0x5a4   :  { %2231 = vmatpush1.bf16.msra.mxu1 %v4337_v41 }
 0x5a5   :  { %2232 = vmatprep.subr.bf16.mxu1 %v4342_v16  ;;  %v4363_v16 = vld [vmem:[#allocation16 + $0x200] ss:$8 sps:$4 sm:$0xff]  }
 0x5a8   :  { %2233 = vmatpush1.bf16.msra.mxu1 %v4340_v18  ;;  %v4368_v18 = vld [vmem:[#allocation16 + $0x214] ss:$8 sps:$4 sm:$0xff]  }
 0x5a9   :  { %2234 = vmatprep.subr.bf16.mxu1 %v4345_v19 }
 0x5ac   :  { %2235 = vmatpush1.bf16.msra.mxu1 %v4343_v21  ;;  %v4366_v21 = vld [vmem:[#allocation16 + $0x210] ss:$8 sps:$4 sm:$0xff]  }
 0x5ad   :  { %2236 = vmatprep.subr.bf16.mxu1 %v4348_v22  ;;  %v4371_v22 = vld [vmem:[#allocation16 + $0x224] ss:$8 sps:$4 sm:$0xff]  }
 0x5b0   :  { %2237 = vmatpush1.bf16.msra.mxu1 %v4346_v23  ;;  %v4369_v23 = vld [vmem:[#allocation16 + $0x220] ss:$8 sps:$4 sm:$0xff]  }
 0x5b1   :  { %2238 = vmatprep.subr.bf16.mxu1 %v4351_v24  ;;  %v4374_v24 = vld [vmem:[#allocation16 + $0x234] ss:$8 sps:$4 sm:$0xff]  }
 0x5b4   :  { %2239 = vmatpush1.bf16.msra.mxu1 %v4349_v25  ;;  %v4372_v25 = vld [vmem:[#allocation16 + $0x230] ss:$8 sps:$4 sm:$0xff]  }
 0x5b5   :  { %2240 = vmatprep.subr.bf16.mxu1 %v4354_v26  ;;  %v4377_v26 = vld [vmem:[#allocation16 + $0x244] ss:$8 sps:$4 sm:$0xff]  }
 0x5b8   :  { %2241 = vmatpush1.bf16.msra.mxu1 %v4352_v28  ;;  %v4375_v28 = vld [vmem:[#allocation16 + $0x240] ss:$8 sps:$4 sm:$0xff]  }
 0x5b9   :  { %4009 = vmatprep.subr.bf16.mxu1 %v4943_v5 }
 0x5bb   :  { %2243 = vmatmul.mubr.bf16.vlgmr.msra.gmra.mrb[20].mxu1 %v1516_v30  ;;  %v808_v30 = vrot.slane %v5354_v36, %v807_v27 }
 0x5bc   :  { %4025 = vmatprep.mubr.msk.bf16.mxu1 %vm4944_vm1, %v4943_v5 }
 0x5bd   :  { %v1356_v33 = vadd.f32 %v5363_v59, %v808_v30  ;;  %v4393_v59 = vld [vmem:[#allocation16 + $0x2a0] ss:$8 sps:$4 sm:$0xff]  }
 0x5bf   :  { %v3613_v37 = vmul.f32 -1.442695, %v1356_v33 }
 0x64e   :  { %v1991_v43 = vpop.f32.mrb[16].mxu1 }
 0x64f   :  { %v3987_v44 = vpop.f32.mrb[17].mxu1  ;;  %v1992_v51 = vadd.f32 %v3660_v46, %v1991_v43  ;;  %v4392_v43 = vld [vmem:[#allocation16 + $0x294] ss:$8 sps:$4 sm:$0xff]  }
 0x650   :  { %v1994_v0 = vpop.f32.mrb[18].mxu1  ;;  %v4390_v44 = vld [vmem:[#allocation16 + $0x290] ss:$8 sps:$4 sm:$0xff]  }
 0x651   :  { %v3988_v45 = vpop.f32.mrb[19].mxu1  ;;  %v3669_v53 = vmul.f32 -1.442695, %v1992_v51  ;;  %v4395_v0 = vld [vmem:[#allocation16 + $0x2a4] ss:$8 sps:$4 sm:$0xff]  }
 0x653   :  { %4555 = vpow2.f32 %v3669_v53  ;;  %v4404_v53 = vld [vmem:[#allocation16 + $0x2d4] ss:$8 sps:$4 sm:$0xff]  }
 0x654   :  { %4557 = vpow2.f32 %v3614_v54  ;;  %v4402_v54 = vld [vmem:[#allocation16 + $0x2d0] ss:$8 sps:$4 sm:$0xff]  }
 0x65d   :  { %v4556_v55 = vpop.eup %4555 }
 0x65e   :  { %v4558_v56 = vpop.eup %4557  ;;  %v2000_v57 = vadd.f32 1.0, %v4556_v55  ;;  %v4407_v55 = vld [vmem:[#allocation16 + $0x2e4] ss:$8 sps:$4 sm:$0xff]  }
 0x65f   :  { %v1479_v15 = vadd.f32 1.0, %v4558_v56  ;;  %v4405_v56 = vld [vmem:[#allocation16 + $0x2e0] ss:$8 sps:$4 sm:$0xff]  }
 0x660   :  { %4559 = vrcp.f32 %v2000_v57  ;;  %v4410_v57 = vld [vmem:[#allocation16 + $0x2f4] ss:$8 sps:$4 sm:$0xff]  }
 0x661   :  { %4561 = vrcp.f32 %v1479_v15 }
 0x662   :  { %4563 = vpow2.f32 %v3613_v37 }
 0x66a   :  { %v4560_v61 = vpop.eup %4559 }
 0x66b   :  { %v4562_v6 = vpop.eup %4561  ;;  %v2003_v9 = vmul.f32 %v4560_v61, %v1992_v51  ;;  %v4401_v51 = vld [vmem:[#allocation16 + $0x2c4] ss:$8 sps:$4 sm:$0xff]  }
 0x66c   :  { %v1509_v41 = vmul.f32 %v4562_v6, %v1358_v52  ;;  %v4564_v45 = vpop.eup %4563  ;;  %v4399_v52 = vld [vmem:[#allocation16 + $0x2c0] ss:$8 sps:$4 sm:$0xff]   ;;  %v4416_v6 = vld [vmem:[#allocation19 + $0xa8] sm:$0xff]  }
 0x66d   :  { %v1478_v46 = vadd.f32 1.0, %v4564_v45 }
 0x66e   :  { %v1519_v19 = vpack.c.bf16 %v1509_v41, %v1509_v41 }
 0x66f   :  { %4565 = vrcp.f32 %v1478_v46 }
 0x679   :  { %v4566_v15 = vpop.eup %4565 }
 0x68e   :  { %v2244_v1 = vpop.f32.mrb[20].mxu1 }
 0x68f   :  { %v2245_v2 = vadd.f32 %v2244_v1, %v2043_v38  ;;  %v2246_v4 = vpop.f32.mrb[21].mxu1  ;;  %v1508_v38 = vmul.f32 %v4566_v15, %v1356_v33  ;;  %v4411_v1 = vld [vmem:[#allocation19 + $0x80] sm:$0xff]   ;;  %v4436_v15 = vld [vmem:[#allocation16 + $0x354] ss:$8 sps:$4 sm:$0xff]  }
 0x690   :  { %v2248_v62 = vpop.f32.mrb[22].mxu1  ;;  %v2247_v13 = vadd.f32 %v2246_v4, %v2047_v3  ;;  %4010 = vmatpush3.bf16.msra.mxu1 %v4411_v1  ;;  %v4413_v3 = vld [vmem:[#allocation19 + $0x90] sm:$0xff]   ;;  %v4414_v4 = vld [vmem:[#allocation19 + $0x98] sm:$0xff]  }
 0x691   :  { %v2251_v10 = vadd.f32 1.0, %v2245_v2  ;;  %v2249_v11 = vpop.f32.mrb[23].mxu1  ;;  %v1518_v61 = vpack.c.bf16 %v1508_v38, %v1508_v38  ;;  %v4412_v2 = vld [vmem:[#allocation19 + $0x88] sm:$0xff]   ;;  %4011 = vmatprep.subr.bf16.mxu1 %v4943_v5  ;;  %v4415_v62 = vld [vmem:[#allocation19 + $0xa0] sm:$0xff]  }
 0x692   :  { %v4421_v11 = vld [vmem:[#allocation16 + $0x304] ss:$8 sps:$4 sm:$0xff]   ;;  %v4434_v38 = vld [vmem:[#allocation16 + $0x350] ss:$8 sps:$4 sm:$0xff]  }
 0x693   :  { %v2252_v12 = vmul.f32 %v2251_v10, %v2003_v9  ;;  %v4417_v9 = vld [vmem:[#allocation19 + $0xb0] sm:$0xff]   ;;  %v4418_v10 = vld [vmem:[#allocation19 + $0xb8] sm:$0xff]  }
 0x694   :  { %4012 = vmatpush3.bf16.msra.mxu1 %v4412_v2  ;;  %v4437_v2 = vld [vmem:[#allocation16 + $0x360] ss:$8 sps:$4 sm:$0xff]  }
 0x695   :  { %v2253_v14 = vadd.f32 %v2252_v12, %v2247_v13  ;;  %4013 = vmatprep.subr.bf16.mxu1 %v4943_v5 }
 0x697   :  { %v2254_v17 = vpack.c.bf16 %v2253_v14, %v2253_v14 }
 0x698   :  { %4014 = vmatpush3.bf16.msra.mxu1 %v4413_v3  ;;  %v4442_v3 = vld [vmem:[#allocation16 + $0x374] ss:$8 sps:$4 sm:$0xff]  }
 0x699   :  { %4006 = vmatmul.mubr.bf16.vlgmr.msra.gmra.mrb[20].mxu0 %v2254_v17  ;;  %4015 = vmatprep.subr.bf16.mxu1 %v4943_v5  ;;  %v3702_v17 = vld [vmem:[#allocation20 + $0x1] ss:$0 sm:$0xff] }
 0x69a   :  { %2582 = vmatpush1.bf16.msra.mxu0 %v4363_v16  ;;  %2613 = vmatprep.mubr.bf16.mxu0 %v1519_v19  ;;  %v819_v16 = vsub.s32 7, %v5288_v48 }
 0x69b   :  { %2583 = vmatprep.subr.bf16.mxu0 %v4368_v18 }
 0x69c   :  { %4016 = vmatpush3.bf16.msra.mxu1 %v4414_v4  ;;  %v820_v18 = vrot.slane %v5354_v36, %v819_v16  ;;  %v4455_v16 = vld [vmem:[#allocation16 + $0x3c0] ss:$8 sps:$4 sm:$0xff]  }
 0x69d   :  { %4017 = vmatprep.subr.bf16.mxu1 %v4943_v5 }
 0x69e   :  { %2584 = vmatpush1.bf16.msra.mxu0 %v4366_v21  ;;  %v1399_v21 = vadd.f32 %v5369_v63, %v820_v18  ;;  %v4458_v18 = vld [vmem:[#allocation16 + $0x3d0] ss:$8 sps:$4 sm:$0xff]  }
 0x69f   :  { %2585 = vmatprep.subr.bf16.mxu0 %v4371_v22 }
 0x6a0   :  { %4018 = vmatpush3.bf16.msra.mxu1 %v4415_v62  ;;  %v4440_v62 = vld [vmem:[#allocation16 + $0x370] ss:$8 sps:$4 sm:$0xff]  }
 0x6a1   :  { %4019 = vmatprep.subr.bf16.mxu1 %v4943_v5 }
 0x6a2   :  { %2586 = vmatpush1.bf16.msra.mxu0 %v4369_v23  ;;  %v3616_v23 = vmul.f32 -1.442695, %v1399_v21 }
 0x6a3   :  { %2587 = vmatprep.subr.bf16.mxu0 %v4374_v24 }
 0x6a4   :  { %4020 = vmatpush3.bf16.msra.mxu1 %v4416_v6  ;;  %v4443_v6 = vld [vmem:[#allocation16 + $0x380] ss:$8 sps:$4 sm:$0xff]  }
 0x6a5   :  { %4021 = vmatprep.subr.bf16.mxu1 %v4943_v5 }
 0x6a6   :  { %2588 = vmatpush1.bf16.msra.mxu0 %v4372_v25 }
 0x6a7   :  { %2589 = vmatprep.subr.bf16.mxu0 %v4377_v26 }
 0x6a8   :  { %4022 = vmatpush3.bf16.msra.mxu1 %v4417_v9  ;;  %v4446_v9 = vld [vmem:[#allocation16 + $0x390] ss:$8 sps:$4 sm:$0xff]  }
 0x6a9   :  { %4023 = vmatprep.subr.bf16.mxu1 %v4943_v5 }
 0x6aa   :  { %2590 = vmatpush1.bf16.msra.mxu0 %v4375_v28  ;;  %v2409_v28 = vld [vmem:[#allocation17 + $0x4] sm:$0x3] }
 0x6ab   :  { %2591 = vmatprep.subr.bf16.mxu0 %v4380_v29  ;;  %v2414_v29 = vrot.slane %v2409_v28, %v5291_v49  ;;  %v2418_v33 = vrot.slane %v2409_v28, %v5294_v50  ;;  %v4468_v28 = vld [vmem:[#allocation19 + $0xc8] sm:$0xff]  }
 0x6ac   :  { %4024 = vmatpush3.bf16.msra.mxu1 %v4418_v10  ;;  %v4451_v10 = vld [vmem:[#allocation16 + $0x3a4] ss:$8 sps:$4 sm:$0xff]  }
 0x6ad   :  { %2952 = vmatprep.subr.bf16.mxu1 %v4421_v11 }
 0x6ae   :  { %2592 = vmatpush1.bf16.msra.mxu0 %v4378_v31 }
 0x6af   :  { %2593 = vmatprep.subr.bf16.mxu0 %v4383_v32 }
 0x6b2   :  { %2594 = vmatpush1.bf16.msra.mxu0 %v4381_v34 }
 0x6b3   :  { %2595 = vmatprep.subr.bf16.mxu0 %v4386_v35 }
 0x6b6   :  { %2596 = vmatpush1.bf16.msra.mxu0 %v4384_v39 }
 0x6b7   :  { %2597 = vmatprep.subr.bf16.mxu0 %v4389_v40 }
 0x6ba   :  { %2598 = vmatpush1.bf16.msra.mxu0 %v4387_v42 }
 0x6bb   :  { %2599 = vmatprep.subr.bf16.mxu0 %v4392_v43 }
 0x6be   :  { %2600 = vmatpush1.bf16.msra.mxu0 %v4390_v44 }
 0x6bf   :  { %2601 = vmatprep.subr.bf16.mxu0 %v4395_v0 }
 0x6c2   :  { %2602 = vmatpush1.bf16.msra.mxu0 %v4393_v59  ;;  %v4419_v59 = vld [vmem:[#allocation16 + $0x300] ss:$8 sps:$4 sm:$0xff]  }
 0x6c3   :  { %2603 = vmatprep.subr.bf16.mxu0 %v4398_v20  ;;  %v4424_v20 = vld [vmem:[#allocation16 + $0x314] ss:$8 sps:$4 sm:$0xff]  }
 0x6c6   :  { %2604 = vmatpush1.bf16.msra.mxu0 %v4396_v47  ;;  %v4422_v47 = vld [vmem:[#allocation16 + $0x310] ss:$8 sps:$4 sm:$0xff]  }
 0x6c7   :  { %2605 = vmatprep.subr.bf16.mxu0 %v4401_v51  ;;  %v4427_v51 = vld [vmem:[#allocation16 + $0x324] ss:$8 sps:$4 sm:$0xff]  }
 0x6ca   :  { %2606 = vmatpush1.bf16.msra.mxu0 %v4399_v52  ;;  %v4425_v52 = vld [vmem:[#allocation16 + $0x320] ss:$8 sps:$4 sm:$0xff]  }
 0x6cb   :  { %2607 = vmatprep.subr.bf16.mxu0 %v4404_v53  ;;  %v4430_v53 = vld [vmem:[#allocation16 + $0x334] ss:$8 sps:$4 sm:$0xff]  }
 0x6ce   :  { %2608 = vmatpush1.bf16.msra.mxu0 %v4402_v54  ;;  %v4428_v54 = vld [vmem:[#allocation16 + $0x330] ss:$8 sps:$4 sm:$0xff]  }
 0x6cf   :  { %2609 = vmatprep.subr.bf16.mxu0 %v4407_v55  ;;  %v4433_v55 = vld [vmem:[#allocation16 + $0x344] ss:$8 sps:$4 sm:$0xff]  }
 0x6d2   :  { %2610 = vmatpush1.bf16.msra.mxu0 %v4405_v56  ;;  %v815_v56 = vsub.s32 6, %v5288_v48  ;;  %v4445_v48 = vld [vmem:[#allocation16 + $0x384] ss:$8 sps:$4 sm:$0xff]  }
 0x6d3   :  { %2611 = vmatprep.subr.bf16.mxu0 %v4410_v57  ;;  %v4431_v57 = vld [vmem:[#allocation16 + $0x340] ss:$8 sps:$4 sm:$0xff]  }
 0x6d6   :  { %2612 = vmatpush1.bf16.msra.mxu0 %v4408_v58  ;;  %v816_v58 = vrot.slane %v5354_v36, %v815_v56  ;;  %v4448_v36 = vld [vmem:[#allocation16 + $0x394] ss:$8 sps:$4 sm:$0xff]  }
 0x6d7   :  { %4029 = vmatprep.subr.bf16.mxu0 %v4943_v5 }
 0x6d8   :  { %v1397_v1 = vadd.f32 %v5365_v60, %v816_v58  ;;  %v4449_v60 = vld [vmem:[#allocation16 + $0x3a0] ss:$8 sps:$4 sm:$0xff]  }
 0x6d9   :  { %2614 = vmatmul.mubr.bf16.vlgmr.msra.gmra.mrb[24].mxu0 %v1518_v61  ;;  %v4439_v61 = vld [vmem:[#allocation16 + $0x364] ss:$8 sps:$4 sm:$0xff]  }
 0x6da   :  { %4045 = vmatprep.mubr.msk.bf16.mxu0 %vm4944_vm1, %v4943_v5  ;;  %v3615_v4 = vmul.f32 -1.442695, %v1397_v1 }
 0x76c   :  { %v2362_v12 = vpop.f32.mrb[20].mxu0 }
 0x76d   :  { %v4007_v13 = vpop.f32.mrb[21].mxu0  ;;  %v2363_v19 = vadd.f32 %v3702_v17, %v2362_v12  ;;  %v4454_v12 = vld [vmem:[#allocation16 + $0x3b4] ss:$8 sps:$4 sm:$0xff]  }
 0x76e   :  { %v2365_v41 = vpop.f32.mrb[22].mxu0  ;;  %v4460_v17 = vld [vmem:[#allocation16 + $0x3d4] ss:$8 sps:$4 sm:$0xff]  }
 0x76f   :  { %v4008_v14 = vpop.f32.mrb[23].mxu0  ;;  %v3711_v22 = vmul.f32 -1.442695, %v2363_v19  ;;  %v4452_v41 = vld [vmem:[#allocation16 + $0x3b0] ss:$8 sps:$4 sm:$0xff]  }
 0x770   :  { %v4457_v14 = vld [vmem:[#allocation16 + $0x3c4] ss:$8 sps:$4 sm:$0xff]  }
 0x771   :  { %4567 = vpow2.f32 %v3711_v22  ;;  %v4466_v22 = vld [vmem:[#allocation16 + $0x3f4] ss:$8 sps:$4 sm:$0xff]  }
 0x772   :  { %4569 = vpow2.f32 %v3616_v23 }
 0x77b   :  { %v4568_v24 = vpop.eup %4567 }
 0x77c   :  { %v4570_v25 = vpop.eup %4569  ;;  %v2371_v26 = vadd.f32 1.0, %v4568_v24  ;;  %v4464_v24 = vld [vmem:[#allocation16 + $0x3f0] ss:$8 sps:$4 sm:$0xff]  }
 0x77d   :  { %v1481_v27 = vadd.f32 1.0, %v4570_v25 }
 0x77e   :  { %4571 = vrcp.f32 %v2371_v26 }
 0x77f   :  { %4573 = vrcp.f32 %v1481_v27  ;;  %v4467_v27 = vld [vmem:[#allocation19 + $0xc0] sm:$0xff]  }
 0x780   :  { %4575 = vpow2.f32 %v3615_v4  ;;  %4030 = vmatpush3.bf16.msra.mxu0 %v4467_v27  ;;  %v4501_v27 = vld [vmem:[#allocation16 + $0x484] ss:$8 sps:$4 sm:$0xff]  }
 0x781   :  { %4031 = vmatprep.subr.bf16.mxu0 %v4943_v5 }
 0x784   :  { %4032 = vmatpush3.bf16.msra.mxu0 %v4468_v28  ;;  %v4499_v28 = vld [vmem:[#allocation16 + $0x480] ss:$8 sps:$4 sm:$0xff]  }
 0x785   :  { %4033 = vmatprep.subr.bf16.mxu0 %v4943_v5 }
 0x788   :  { %v4572_v30 = vpop.eup %4571 }
 0x789   :  { %v4574_v35 = vpop.eup %4573  ;;  %v2374_v37 = vmul.f32 %v4572_v30, %v2363_v19  ;;  %v4463_v19 = vld [vmem:[#allocation16 + $0x3e4] ss:$8 sps:$4 sm:$0xff]  }
 0x78a   :  { %v1511_v44 = vmul.f32 %v4574_v35, %v1399_v21  ;;  %v4576_v11 = vpop.eup %4575  ;;  %v4461_v21 = vld [vmem:[#allocation16 + $0x3e0] ss:$8 sps:$4 sm:$0xff]  }
 0x78b   :  { %v1480_v13 = vadd.f32 1.0, %v4576_v11  ;;  %v4470_v30 = vld [vmem:[#allocation19 + $0xd8] sm:$0xff]  }
 0x78c   :  { %v1521_v46 = vpack.c.bf16 %v1511_v44, %v1511_v44  ;;  %v4483_v11 = vld [vmem:[#allocation16 + $0x424] ss:$8 sps:$4 sm:$0xff]  }
 0x78d   :  { %4577 = vrcp.f32 %v1480_v13  ;;  %v4486_v13 = vld [vmem:[#allocation16 + $0x434] ss:$8 sps:$4 sm:$0xff]  }
 0x797   :  { %v4578_v23 = vpop.eup %4577 }
 0x798   :  { %v1510_v25 = vmul.f32 %v4578_v23, %v1397_v1  ;;  %v4493_v23 = vld [vmem:[#allocation16 + $0x460] ss:$8 sps:$4 sm:$0xff]  }
 0x79a   :  { %v1520_v26 = vpack.c.bf16 %v1510_v25, %v1510_v25 }
 0x7ac   :  { %v2615_v31 = vpop.f32.mrb[24].mxu0 }
 0x7ad   :  { %v2616_v32 = vadd.f32 %v2615_v31, %v2414_v29  ;;  %v2617_v34 = vpop.f32.mrb[25].mxu0  ;;  %v4469_v29 = vld [vmem:[#allocation19 + $0xd0] sm:$0xff]   ;;  %v4471_v31 = vld [vmem:[#allocation19 + $0xe0] sm:$0xff]  }
 0x7ae   :  { %v2619_v63 = vpop.f32.mrb[26].mxu0  ;;  %v2618_v43 = vadd.f32 %v2617_v34, %v2418_v33  ;;  %4034 = vmatpush3.bf16.msra.mxu0 %v4469_v29  ;;  %v4473_v33 = vld [vmem:[#allocation19 + $0xf0] sm:$0xff]   ;;  %v4474_v34 = vld [vmem:[#allocation19 + $0xf8] sm:$0xff]  }
 0x7af   :  { %v2622_v39 = vadd.f32 1.0, %v2616_v32  ;;  %v2620_v40 = vpop.f32.mrb[27].mxu0  ;;  %4035 = vmatprep.subr.bf16.mxu0 %v4943_v5  ;;  %v4472_v32 = vld [vmem:[#allocation19 + $0xe8] sm:$0xff]   ;;  %v4477_v63 = vld [vmem:[#allocation16 + $0x404] ss:$8 sps:$4 sm:$0xff]  }
 0x7b0   :  { %v4504_v29 = vld [vmem:[#allocation16 + $0x494] ss:$8 sps:$4 sm:$0xff]  }
 0x7b1   :  { %v2623_v42 = vmul.f32 %v2622_v39, %v2374_v37 }
 0x7b2   :  { %4036 = vmatpush3.bf16.msra.mxu0 %v4470_v30  ;;  %v4502_v30 = vld [vmem:[#allocation16 + $0x490] ss:$8 sps:$4 sm:$0xff]  }
 0x7b3   :  { %v2624_v0 = vadd.f32 %v2623_v42, %v2618_v43  ;;  %4037 = vmatprep.subr.bf16.mxu0 %v4943_v5  ;;  %v786_v42 = vld [vmem:[%s5477_s10 + $0x8] sm:$0x3]  ;;  %v3744_v43 = vld [vmem:[#allocation20 + $0x2] ss:$0 sm:$0xff] }
 0x7b4   :  { %v828_v44 = vrot.slane %v786_v42, %v5294_v50 }
 0x7b5   :  { %v2625_v45 = vpack.c.bf16 %v2624_v0, %v2624_v0 }
 0x7b6   :  { %4038 = vmatpush3.bf16.msra.mxu0 %v4471_v31  ;;  %v4507_v31 = vld [vmem:[#allocation16 + $0x4a4] ss:$8 sps:$4 sm:$0xff]  }
 0x7b7   :  { %4026 = vmatmul.mubr.bf16.vlgmr.msra.gmra.mrb[24].mxu1 %v2625_v45  ;;  %4039 = vmatprep.subr.bf16.mxu0 %v4943_v5 }
 0x7b8   :  { %2953 = vmatpush1.bf16.msra.mxu1 %v4419_v59  ;;  %2984 = vmatprep.mubr.bf16.mxu1 %v1521_v46  ;;  %v1440_v59 = vadd.f32 %v5375_v8, %v828_v44  ;;  %v4522_v44 = vld [vmem:[#allocation16 + $0x4f4] ss:$8 sps:$4 sm:$0xff]  }
 0x7b9   :  { %2954 = vmatprep.subr.bf16.mxu1 %v4424_v20 }
 0x7ba   :  { %4040 = vmatpush3.bf16.msra.mxu0 %v4472_v32  ;;  %v3618_v20 = vmul.f32 -1.442695, %v1440_v59 }
 0x7bb   :  { %4041 = vmatprep.subr.bf16.mxu0 %v4943_v5 }
 0x7bc   :  { %2955 = vmatpush1.bf16.msra.mxu1 %v4422_v47 }
 0x7bd   :  { %2956 = vmatprep.subr.bf16.mxu1 %v4427_v51 }
 0x7be   :  { %4042 = vmatpush3.bf16.msra.mxu0 %v4473_v33  ;;  %v4510_v33 = vld [vmem:[#allocation16 + $0x4b4] ss:$8 sps:$4 sm:$0xff]  }
 0x7bf   :  { %4043 = vmatprep.subr.bf16.mxu0 %v4943_v5 }
 0x7c0   :  { %2957 = vmatpush1.bf16.msra.mxu1 %v4425_v52 }
 0x7c1   :  { %2958 = vmatprep.subr.bf16.mxu1 %v4430_v53  ;;  %v2780_v53 = vld [vmem:[#allocation17 + $0x6] sm:$0x3] }
 0x7c2   :  { %4044 = vmatpush3.bf16.msra.mxu0 %v4474_v34 }
 0x7c3   :  { %3323 = vmatprep.subr.bf16.mxu0 %v4477_v63  ;;  %v4508_v63 = vld [vmem:[#allocation16 + $0x4b0] ss:$8 sps:$4 sm:$0xff]  }
 0x7c4   :  { %2959 = vmatpush1.bf16.msra.mxu1 %v4428_v54  ;;  %v2785_v54 = vrot.slane %v2780_v53, %v5291_v49 }
 0x7c5   :  { %2960 = vmatprep.subr.bf16.mxu1 %v4433_v55 }
 0x7c8   :  { %2961 = vmatpush1.bf16.msra.mxu1 %v4431_v57 }
 0x7c9   :  { %2962 = vmatprep.subr.bf16.mxu1 %v4436_v15  ;;  %v2789_v15 = vrot.slane %v2780_v53, %v5294_v50  ;;  %v4527_v53 = vld [vmem:[#allocation22 + $0x20] sm:$0xff]  }
 0x7cc   :  { %2963 = vmatpush1.bf16.msra.mxu1 %v4434_v38 }
 0x7cd   :  { %2964 = vmatprep.subr.bf16.mxu1 %v4439_v61 }
 0x7d0   :  { %2965 = vmatpush1.bf16.msra.mxu1 %v4437_v2 }
 0x7d1   :  { %2966 = vmatprep.subr.bf16.mxu1 %v4442_v3 }
 0x7d4   :  { %2967 = vmatpush1.bf16.msra.mxu1 %v4440_v62 }
 0x7d5   :  { %2968 = vmatprep.subr.bf16.mxu1 %v4445_v48 }
 0x7d8   :  { %2969 = vmatpush1.bf16.msra.mxu1 %v4443_v6  ;;  %v4475_v6 = vld [vmem:[#allocation16 + $0x400] ss:$8 sps:$4 sm:$0xff]  }
 0x7d9   :  { %2970 = vmatprep.subr.bf16.mxu1 %v4448_v36 }
 0x7dc   :  { %2971 = vmatpush1.bf16.msra.mxu1 %v4446_v9  ;;  %v4480_v9 = vld [vmem:[#allocation16 + $0x414] ss:$8 sps:$4 sm:$0xff]  }
 0x7dd   :  { %2972 = vmatprep.subr.bf16.mxu1 %v4451_v10 }
 0x7e0   :  { %2973 = vmatpush1.bf16.msra.mxu1 %v4449_v60  ;;  %v4478_v60 = vld [vmem:[#allocation16 + $0x410] ss:$8 sps:$4 sm:$0xff]  }
 0x7e1   :  { %2974 = vmatprep.subr.bf16.mxu1 %v4454_v12  ;;  %v4481_v12 = vld [vmem:[#allocation16 + $0x420] ss:$8 sps:$4 sm:$0xff]  }
 0x7e4   :  { %2975 = vmatpush1.bf16.msra.mxu1 %v4452_v41  ;;  %v4484_v41 = vld [vmem:[#allocation16 + $0x430] ss:$8 sps:$4 sm:$0xff]  }
 0x7e5   :  { %2976 = vmatprep.subr.bf16.mxu1 %v4457_v14  ;;  %v4489_v14 = vld [vmem:[#allocation16 + $0x444] ss:$8 sps:$4 sm:$0xff]  }
 0x7e8   :  { %2977 = vmatpush1.bf16.msra.mxu1 %v4455_v16  ;;  %v4487_v16 = vld [vmem:[#allocation16 + $0x440] ss:$8 sps:$4 sm:$0xff]  }
 0x7e9   :  { %2978 = vmatprep.subr.bf16.mxu1 %v4460_v17  ;;  %v4492_v17 = vld [vmem:[#allocation16 + $0x454] ss:$8 sps:$4 sm:$0xff]  }
 0x7ec   :  { %2979 = vmatpush1.bf16.msra.mxu1 %v4458_v18  ;;  %v824_v18 = vrot.slane %v786_v42, %v5291_v49  ;;  %v4519_v42 = vld [vmem:[#allocation16 + $0x4e4] ss:$8 sps:$4 sm:$0xff]  }
 0x7ed   :  { %2980 = vmatprep.subr.bf16.mxu1 %v4463_v19  ;;  %v4490_v19 = vld [vmem:[#allocation16 + $0x450] ss:$8 sps:$4 sm:$0xff]  }
 0x7f0   :  { %2981 = vmatpush1.bf16.msra.mxu1 %v4461_v21  ;;  %v4495_v21 = vld [vmem:[#allocation16 + $0x464] ss:$8 sps:$4 sm:$0xff]  }
 0x7f1   :  { %2982 = vmatprep.subr.bf16.mxu1 %v4466_v22  ;;  %v1438_v22 = vadd.f32 %v5373_v7, %v824_v18  ;;  %v4505_v7 = vld [vmem:[#allocation16 + $0x4a0] ss:$8 sps:$4 sm:$0xff]  }
 0x7f3   :  { %v3617_v25 = vmul.f32 -1.442695, %v1438_v22 }
 0x7f4   :  { %2983 = vmatpush1.bf16.msra.mxu1 %v4464_v24  ;;  %v4498_v24 = vld [vmem:[#allocation16 + $0x474] ss:$8 sps:$4 sm:$0xff]  }
 0x7f5   :  { %4049 = vmatprep.subr.bf16.mxu1 %v4943_v5 }
 0x7f7   :  { %2985 = vmatmul.mubr.bf16.vlgmr.msra.gmra.mrb[28].mxu1 %v1520_v26  ;;  %v4496_v26 = vld [vmem:[#allocation16 + $0x470] ss:$8 sps:$4 sm:$0xff]  }
 0x7f8   :  { %4065 = vmatprep.mubr.msk.bf16.mxu1 %vm4944_vm1, %v4943_v5 }
 0x88a   :  { %v2733_v35 = vpop.f32.mrb[24].mxu1 }
 0x88b   :  { %v4027_v37 = vpop.f32.mrb[25].mxu1  ;;  %v2734_v0 = vadd.f32 %v3744_v43, %v2733_v35  ;;  %v4513_v35 = vld [vmem:[#allocation16 + $0x4c4] ss:$8 sps:$4 sm:$0xff]   ;;  %v4517_v43 = vld [vmem:[#allocation16 + $0x4e0] ss:$8 sps:$4 sm:$0xff]  }
 0x88c   :  { %v2736_v39 = vpop.f32.mrb[26].mxu1  ;;  %v4511_v37 = vld [vmem:[#allocation16 + $0x4c0] ss:$8 sps:$4 sm:$0xff]  }
 0x88d   :  { %v4028_v40 = vpop.f32.mrb[27].mxu1  ;;  %v3753_v45 = vmul.f32 -1.442695, %v2734_v0  ;;  %v4516_v39 = vld [vmem:[#allocation16 + $0x4d4] ss:$8 sps:$4 sm:$0xff]  }
 0x88e   :  { %v4514_v40 = vld [vmem:[#allocation16 + $0x4d0] ss:$8 sps:$4 sm:$0xff]  }
 0x88f   :  { %4579 = vpow2.f32 %v3753_v45 }
 0x890   :  { %4581 = vpow2.f32 %v3618_v20 }
 0x899   :  { %v4580_v46 = vpop.eup %4579 }
 0x89a   :  { %v4582_v47 = vpop.eup %4581  ;;  %v2742_v51 = vadd.f32 1.0, %v4580_v46  ;;  %v4523_v46 = vld [vmem:[#allocation22] sm:$0xff]  }
 0x89b   :  { %v1483_v52 = vadd.f32 1.0, %v4582_v47  ;;  %4050 = vmatpush3.bf16.msra.mxu1 %v4523_v46  ;;  %v4524_v47 = vld [vmem:[#allocation22 + $0x8] sm:$0xff]  }
 0x89c   :  { %4583 = vrcp.f32 %v2742_v51  ;;  %4051 = vmatprep.subr.bf16.mxu1 %v4943_v5  ;;  %v4525_v51 = vld [vmem:[#allocation22 + $0x10] sm:$0xff]  }
 0x89d   :  { %4585 = vrcp.f32 %v1483_v52  ;;  %v4526_v52 = vld [vmem:[#allocation22 + $0x18] sm:$0xff]  }
 0x89e   :  { %4587 = vpow2.f32 %v3617_v25 }
 0x89f   :  { %4052 = vmatpush3.bf16.msra.mxu1 %v4524_v47 }
 0x8a0   :  { %4053 = vmatprep.subr.bf16.mxu1 %v4943_v5 }
 0x8a3   :  { %4054 = vmatpush3.bf16.msra.mxu1 %v4525_v51 }
 0x8a4   :  { %4055 = vmatprep.subr.bf16.mxu1 %v4943_v5 }
 0x8a6   :  { %v4584_v55 = vpop.eup %4583 }
 0x8a7   :  { %v4586_v38 = vpop.eup %4585  ;;  %v2745_v61 = vmul.f32 %v4584_v55, %v2734_v0  ;;  %4056 = vmatpush3.bf16.msra.mxu1 %v4526_v52  ;;  %v4529_v55 = vld [vmem:[#allocation22 + $0x30] sm:$0xff]  }
 0x8a8   :  { %v1513_v62 = vmul.f32 %v4586_v38, %v1440_v59  ;;  %v4588_v32 = vpop.eup %4587  ;;  %v4520_v59 = vld [vmem:[#allocation16 + $0x4f0] ss:$8 sps:$4 sm:$0xff]   ;;  %4057 = vmatprep.subr.bf16.mxu1 %v4943_v5  ;;  %v3786_v38 = vld [vmem:[#allocation20 + $0x3] ss:$0 sm:$0xff] }
 0x8a9   :  { %v1482_v34 = vadd.f32 1.0, %v4588_v32 }
 0x8aa   :  { %v1523_v10 = vpack.c.bf16 %v1513_v62, %v1513_v62 }
 0x8ab   :  { %4589 = vrcp.f32 %v1482_v34  ;;  %4058 = vmatpush3.bf16.msra.mxu1 %v4527_v53 }
 0x8ac   :  { %4059 = vmatprep.subr.bf16.mxu1 %v4943_v5 }
 0x8b5   :  { %v4590_v0 = vpop.eup %4589 }
 0x8b6   :  { %v1512_v45 = vmul.f32 %v4590_v0, %v1438_v22 }
 0x8b8   :  { %v1522_v20 = vpack.c.bf16 %v1512_v45, %v1512_v45 }
 0x8ca   :  { %v2986_v56 = vpop.f32.mrb[28].mxu1 }
 0x8cb   :  { %v2987_v57 = vadd.f32 %v2986_v56, %v2785_v54  ;;  %v2988_v58 = vpop.f32.mrb[29].mxu1  ;;  %v4528_v54 = vld [vmem:[#allocation22 + $0x28] sm:$0xff]   ;;  %v4530_v56 = vld [vmem:[#allocation22 + $0x38] sm:$0xff]  }
 0x8cc   :  { %v2990_v8 = vpop.f32.mrb[30].mxu1  ;;  %v2989_v4 = vadd.f32 %v2988_v58, %v2789_v15  ;;  %4060 = vmatpush3.bf16.msra.mxu1 %v4528_v54 }
 0x8cd   :  { %v2993_v1 = vadd.f32 1.0, %v2987_v57  ;;  %v2991_v2 = vpop.f32.mrb[31].mxu1  ;;  %4061 = vmatprep.subr.bf16.mxu1 %v4943_v5 }
 0x8cf   :  { %v2994_v3 = vmul.f32 %v2993_v1, %v2745_v61 }
 0x8d0   :  { %4062 = vmatpush3.bf16.msra.mxu1 %v4529_v55 }
 0x8d1   :  { %v2995_v48 = vadd.f32 %v2994_v3, %v2989_v4  ;;  %4063 = vmatprep.subr.bf16.mxu1 %v4943_v5  ;;  %v3151_v4 = vld [vmem:[#allocation17 + $0x8] sm:$0x3] }
 0x8d2   :  { %v3156_v62 = vrot.slane %v3151_v4, %v5291_v49  ;;  %v3160_v5 = vrot.slane %v3151_v4, %v5294_v50 }
 0x8d3   :  { %v2996_v36 = vpack.c.bf16 %v2995_v48, %v2995_v48 }
 0x8d4   :  { %4064 = vmatpush3.bf16.msra.mxu1 %v4530_v56 }
 0x8d5   :  { %4046 = vmatmul.mubr.bf16.vlgmr.msra.gmra.mrb[28].mxu0 %v2996_v36 }
 0x8d6   :  { %3324 = vmatpush1.bf16.msra.mxu0 %v4475_v6  ;;  %3355 = vmatprep.mubr.bf16.mxu0 %v1523_v10 }
 0x8d7   :  { %3325 = vmatprep.subr.bf16.mxu0 %v4480_v9 }
 0x8da   :  { %3326 = vmatpush1.bf16.msra.mxu0 %v4478_v60 }
 0x8db   :  { %3327 = vmatprep.subr.bf16.mxu0 %v4483_v11 }
 0x8de   :  { %3328 = vmatpush1.bf16.msra.mxu0 %v4481_v12 }
 0x8df   :  { %3329 = vmatprep.subr.bf16.mxu0 %v4486_v13 }
 0x8e2   :  { %3330 = vmatpush1.bf16.msra.mxu0 %v4484_v41 }
 0x8e3   :  { %3331 = vmatprep.subr.bf16.mxu0 %v4489_v14 }
 0x8e6   :  { %3332 = vmatpush1.bf16.msra.mxu0 %v4487_v16 }
 0x8e7   :  { %3333 = vmatprep.subr.bf16.mxu0 %v4492_v17  ;;  %v3828_v17 = vld [vmem:[%s5485_s18] ss:$0 sm:$0xff] }
 0x8ea   :  { %3334 = vmatpush1.bf16.msra.mxu0 %v4490_v19 }
 0x8eb   :  { %3335 = vmatprep.subr.bf16.mxu0 %v4495_v21 }
 0x8ee   :  { %3336 = vmatpush1.bf16.msra.mxu0 %v4493_v23 }
 0x8ef   :  { %3337 = vmatprep.subr.bf16.mxu0 %v4498_v24 }
 0x8f2   :  { %3338 = vmatpush1.bf16.msra.mxu0 %v4496_v26 }
 0x8f3   :  { %3339 = vmatprep.subr.bf16.mxu0 %v4501_v27 }
 0x8f6   :  { %3340 = vmatpush1.bf16.msra.mxu0 %v4499_v28 }
 0x8f7   :  { %3341 = vmatprep.subr.bf16.mxu0 %v4504_v29 }
 0x8fa   :  { %3342 = vmatpush1.bf16.msra.mxu0 %v4502_v30 }
 0x8fb   :  { %3343 = vmatprep.subr.bf16.mxu0 %v4507_v31 }
 0x8fe   :  { %3344 = vmatpush1.bf16.msra.mxu0 %v4505_v7 }
 0x8ff   :  { %3345 = vmatprep.subr.bf16.mxu0 %v4510_v33 }
 0x902   :  { %3346 = vmatpush1.bf16.msra.mxu0 %v4508_v63 }
 0x903   :  { %3347 = vmatprep.subr.bf16.mxu0 %v4513_v35 }
 0x906   :  { %3348 = vmatpush1.bf16.msra.mxu0 %v4511_v37 }
 0x907   :  { %3349 = vmatprep.subr.bf16.mxu0 %v4516_v39 }
 0x90a   :  { %3350 = vmatpush1.bf16.msra.mxu0 %v4514_v40 }
 0x90b   :  { %3351 = vmatprep.subr.bf16.mxu0 %v4519_v42 }
 0x90e   :  { %3352 = vmatpush1.bf16.msra.mxu0 %v4517_v43 }
 0x90f   :  { %3353 = vmatprep.subr.bf16.mxu0 %v4522_v44 }
 0x912   :  { %3354 = vmatpush1.bf16.msra.mxu0 %v4520_v59 }
 0x915   :  { %3356 = vmatmul.mubr.bf16.vlgmr.msra.gmra.mrb[32].mxu0 %v1522_v20 }
 0x9a8   :  { %v3104_v57 = vpop.f32.mrb[28].mxu0 }
 0x9a9   :  { %v4047_v15 = vpop.f32.mrb[29].mxu0  ;;  %v3105_v61 = vadd.f32 %v3786_v38, %v3104_v57 }
 0x9aa   :  { %v3107_v58 = vpop.f32.mrb[30].mxu0 }
 0x9ab   :  { %v4048_v8 = vpop.f32.mrb[31].mxu0  ;;  %v3795_v1 = vmul.f32 -1.442695, %v3105_v61 }
 0x9ad   :  { %4591 = vpow2.f32 %v3795_v1 }
 0x9b7   :  { %v4592_v2 = vpop.eup %4591 }
 0x9b8   :  { %v3113_v3 = vadd.f32 1.0, %v4592_v2 }
 0x9ba   :  { %4593 = vrcp.f32 %v3113_v3 }
 0x9c4   :  { %v4594_v48 = vpop.eup %4593 }
 0x9c5   :  { %v3116_v60 = vmul.f32 %v4594_v48, %v3105_v61 }
 0x9e8   :  { %v3357_v6 = vpop.f32.mrb[32].mxu0 }
 0x9e9   :  { %v3358_v36 = vadd.f32 %v3357_v6, %v3156_v62  ;;  %v3359_v9 = vpop.f32.mrb[33].mxu0 }
 0x9ea   :  { %v3361_v10 = vpop.f32.mrb[34].mxu0  ;;  %v3360_v41 = vadd.f32 %v3359_v9, %v3160_v5 }
 0x9eb   :  { %v3364_v11 = vadd.f32 1.0, %v3358_v36  ;;  %v3362_v12 = vpop.f32.mrb[35].mxu0 }
 0x9ed   :  { %v3365_v13 = vmul.f32 %v3364_v11, %v3116_v60 }
 0x9ef   :  { %v3366_v14 = vadd.f32 %v3365_v13, %v3360_v41 }
 0x9f1   :  { %v3367_v16 = vpack.c.bf16 %v3366_v14, %v3366_v14 }
 0x9f3   :  { %4066 = vmatmul.mubr.bf16.vlgmr.msra.gmra.mrb[32].mxu1 %v3367_v16 }
 0xac6   :  { %v3473_v49 = vpop.f32.mrb[32].mxu1 }
 0xac7   :  { %v3474_v18 = vadd.f32 %v3828_v17, %v3473_v49  ;;  %v4067_v19 = vpop.f32.mrb[33].mxu1 }
 0xac8   :  { %v3476_v50 = vpop.f32.mrb[34].mxu1 }
 0xac9   :  { %3479 = vst [vmem:[#allocation23] sm:$0xff] %v3474_v18  ;;  %v4068_v21 = vpop.f32.mrb[35].mxu1 }
 0xaca   :  { %4892 = shalt.err (!%p4889_p10)
}
 0xacb   :  { %s5499_s27 = sld [smem:[#allocation36_spill]] }
 0xad1   :  { %s4893_s18 = scalar_lea.hbm %s5499_s27, 128 }
 0xad2   :  { %p4894_p11 = scmp.ne.s32.totalorder %s5499_s27, %s4893_s18  ;;  %p4897_p12 = scmp.lt.u32.totalorder %s4893_s18, %s5499_s27 }
 0xad4   :  { %p4899_p13 = pnand %p4897_p12, %p4894_p11 }
 0xad6   :  { %4902 = shalt.err (!%p4899_p13)
}
 0xad7   :  { %3489 = dma.vmem_to_hbm [thread:$0]  %s3487_s5, 128, %s5499_s27, [#allocation4]  }
 0xad8   :  { %4917 = dma.done.wait [#allocation4], 128  }
 0xad9   :  { %4918 = vsyncadd [#allocation4], 4294967168 }
 0xada   :  { %3493 = vsyncpa [#allocation3], 1 }
 0xadb   :  { %3494 = vsyncpa [#allocation6], 1 }
 0xadc   :  { %3495 = vsyncpa [#allocation9], 1 }
 0xadd   :  { %3496 = vsyncpa [#allocation12], 1 }
 0xade   :  { %3497 = vsyncpa [#allocation15], 1 }
 0xadf   :  { %3498 = vsyncpa [#allocation18], 1 }
 0xae0   :  { %3499 = vsyncpa [#allocation21], 1 }
 0xae1   :  { %3500 = vsyncpa [#allocation4], 1 }

</bundles_post_ra>
